<compile_context>
chip_gen: v5e
topology: v5e:2x2
jax: 0.10.0
libtpu: 0.0.40
codegen_flags: <defaults>
</compile_context>

<pallas_src>
import math

import jax
import jax.numpy as jnp
from jax.experimental import pallas as pl
from jax.experimental.pallas import tpu as pltpu


# --------------------------------------------------------------------------
# helpers
# --------------------------------------------------------------------------
def _round_up(x, m):
    return ((x + m - 1) // m) * m


def _pick_tile_b(batch):
    """Batch tile: multiple of 16 (bf16 sublanes), <=512 rows.

    For batches larger than 512 the tile is sized so the grid has >=2
    (roughly balanced) steps, so v7x megacore sharding of the parallel batch
    axis actually does something, while keeping M large enough to fill the
    256-row MXU on v6e/v7x.
    """
    b16 = _round_up(max(batch, 1), 16)
    if b16 <= 512:
        return b16                      # single grid step; small batch
    n_steps = max(2, -(-b16 // 512))    # ceil(b16 / 512), at least 2
    tile = _round_up(-(-b16 // n_steps), 16)
    return min(512, tile)


# --------------------------------------------------------------------------
# Pallas kernel: encoder MLP with fused mean/logvar head
# --------------------------------------------------------------------------
def _vae_encoder_kernel(
    x_ref,                       # (TILE_B, in_dim_p)   bf16
    w1_ref, b1_ref,              # (in_dim_p, 512) bf16, (1, 512) f32
    w2_ref, b2_ref,              # (512, 256)      bf16, (1, 256) f32
    w3_ref, b3_ref,              # (256, 128)      bf16, (1, 128) f32   (100 padded)
    wh_ref, bh_ref,              # (128, HEAD_P)   bf16, (1, HEAD_P) f32 (fused heads)
    out_ref,                     # (TILE_B, HEAD_P) f32
):
    x = x_ref[...]

    h = jnp.dot(x, w1_ref[...], preferred_element_type=jnp.float32) + b1_ref[...]
    h = jnp.maximum(h, 0.0).astype(jnp.bfloat16)

    h = jnp.dot(h, w2_ref[...], preferred_element_type=jnp.float32) + b2_ref[...]
    h = jnp.maximum(h, 0.0).astype(jnp.bfloat16)

    h = jnp.dot(h, w3_ref[...], preferred_element_type=jnp.float32) + b3_ref[...]
    h = jnp.maximum(h, 0.0).astype(jnp.bfloat16)

    # fused mean/logvar head: columns [0:z) = mean, [z:2z) = logvar, rest = 0-pad
    out_ref[...] = (
        jnp.dot(h, wh_ref[...], preferred_element_type=jnp.float32) + bh_ref[...]
    )


# --------------------------------------------------------------------------
# Parameter construction (PyTorch nn.Linear-style init), then pad/fuse/cast
# --------------------------------------------------------------------------
def _init_linear(key, fan_in, fan_out):
    kw, kb = jax.random.split(key)
    bound = 1.0 / math.sqrt(fan_in)
    # stored (in, out) so the kernel computes h @ W + b
    w = jax.random.uniform(kw, (fan_in, fan_out), jnp.float32, -bound, bound)
    b = jax.random.uniform(kb, (fan_out,), jnp.float32, -bound, bound)
    return w, b


def init_vae_encoder_params(key, in_dim, z_dim):
    keys = jax.random.split(key, 5)
    return {
        "fc1": _init_linear(keys[0], in_dim, 512),
        "fc2": _init_linear(keys[1], 512, 256),
        "fc3": _init_linear(keys[2], 256, 100),
        "mean": _init_linear(keys[3], 100, z_dim),
        "logvar": _init_linear(keys[4], 100, z_dim),
    }


def prepare_params(params, in_dim, z_dim):
    """Pad to lane/MXU-aligned shapes, fuse mean/logvar heads, cast weights bf16."""
    H1, H2, H3 = 512, 256, 100
    in_p = _round_up(in_dim, 128)
    h3_p = _round_up(H3, 128)                       # 100 -> 128
    head_p = max(128, _round_up(2 * z_dim, 128))    # lane-dense fused head width

    w1, b1 = params["fc1"]
    w2, b2 = params["fc2"]
    w3, b3 = params["fc3"]
    wm, bm = params["mean"]
    wv, bv = params["logvar"]

    # fc1: zero-pad input rows (padded x columns are zero too, so no effect)
    w1p = jnp.zeros((in_p, H1), jnp.float32).at[:in_dim, :].set(w1)
    # fc3: zero-pad output cols 100..127 (bias 0 -> ReLU(0) = 0 on pad lanes)
    w3p = jnp.zeros((H2, h3_p), jnp.float32).at[:, :H3].set(w3)
    b3p = jnp.zeros((h3_p,), jnp.float32).at[:H3].set(b3)
    # fused head: [W_mean | W_logvar | 0-pad]; pad rows 100..127 are zero
    wh = jnp.zeros((h3_p, head_p), jnp.float32)
    wh = wh.at[:H3, :z_dim].set(wm).at[:H3, z_dim:2 * z_dim].set(wv)
    bh = jnp.zeros((head_p,), jnp.float32).at[:z_dim].set(bm)
    bh = bh.at[z_dim:2 * z_dim].set(bv)

    prepared = (
        w1p.astype(jnp.bfloat16), b1.reshape(1, -1),
        w2.astype(jnp.bfloat16), b2.reshape(1, -1),
        w3p.astype(jnp.bfloat16), b3p.reshape(1, -1),
        wh.astype(jnp.bfloat16), bh.reshape(1, -1),
    )
    meta = {"in_dim": in_dim, "in_p": in_p, "z_dim": z_dim, "head_p": head_p}
    return prepared, meta


# --------------------------------------------------------------------------
# Wrapper
# --------------------------------------------------------------------------
def vae_encoder_forward(x, prepared, meta):
    """Matches VaeEncoder.forward: returns (mean, logvar), each (B, z_dim)."""
    in_dim, in_p = meta["in_dim"], meta["in_p"]
    z_dim, head_p = meta["z_dim"], meta["head_p"]

    B = x.shape[0]
    x_flat = x.reshape(B, -1)
    assert x_flat.shape[1] == in_dim, "input does not flatten to in_dim"

    # batch tiling
    tile_b = _pick_tile_b(B)
    b_pad = _round_up(B, tile_b)

    # Input path: cast straight to bf16; only materialize a padded copy when
    # batch or feature padding is actually required (avoids an extra HBM
    # round-trip of the dominant streamed tensor).
    x_bf = x_flat.astype(jnp.bfloat16)
    if b_pad != B or in_p != in_dim:
        x_bf = jnp.pad(x_bf, ((0, b_pad - B), (0, in_p - in_dim)))

    grid = (b_pad // tile_b,)

    def resident(shape):
        # weights/biases: same block every grid step -> fetched once, kept in
        # VMEM; single-buffered (no reason to double-buffer constant blocks).
        try:
            return pl.BlockSpec(shape, lambda i: (0, 0),
                                pipeline_mode=pl.Buffered(1))
        except TypeError:  # older jax without pipeline_mode kwarg
            return pl.BlockSpec(shape, lambda i: (0, 0))

    in_specs = [pl.BlockSpec((tile_b, in_p), lambda i: (i, 0))]
    in_specs += [resident(p.shape) for p in prepared]
    out_spec = pl.BlockSpec((tile_b, head_p), lambda i: (i, 0))

    # VMEM budget: single-buffered resident weights + double-buffered
    # streamed blocks + slack, capped at 48 MiB (headroom on v7x's 64 MiB).
    resident_bytes = sum(int(p.size) * p.dtype.itemsize for p in prepared)
    block_bytes = tile_b * in_p * 2 + tile_b * head_p * 4
    vmem_budget = int(min(resident_bytes + 2 * block_bytes + (16 << 20), 48 << 20))

    out = pl.pallas_call(
        _vae_encoder_kernel,
        grid=grid,
        in_specs=in_specs,
        out_specs=out_spec,
        out_shape=jax.ShapeDtypeStruct((b_pad, head_p), jnp.float32),
        compiler_params=pltpu.CompilerParams(
            dimension_semantics=("parallel",),       # shard batch across TCs (v7x)
            vmem_limit_bytes=vmem_budget,
        ),
    )(x_bf, *prepared)

    mean = out[:B, :z_dim]
    logvar = out[:B, z_dim:2 * z_dim]
    return mean, logvar


# --------------------------------------------------------------------------
# Pure-JAX reference (fp32, unpadded) for correctness check
# --------------------------------------------------------------------------
def _reference_forward(x_flat, params):
    w1, b1 = params["fc1"]
    w2, b2 = params["fc2"]
    w3, b3 = params["fc3"]
    wm, bm = params["mean"]
    wv, bv = params["logvar"]
    h = jnp.maximum(x_flat @ w1 + b1, 0.0)
    h = jnp.maximum(h @ w2 + b2, 0.0)
    h = jnp.maximum(h @ w3 + b3, 0.0)
    return h @ wm + bm, h @ wv + bv


# --------------------------------------------------------------------------
# Example / smoke test
# --------------------------------------------------------------------------
if __name__ == "__main__":
    batch, channels, height, width = 2, 4, 16, 16
    in_dim = channels * height * width     # 1024
    z_dim = 8

    key = jax.random.PRNGKey(0)
    k_params, k_x = jax.random.split(key)

    raw_params = init_vae_encoder_params(k_params, in_dim, z_dim)
    prepared, meta = prepare_params(raw_params, in_dim, z_dim)

    # NCHW input, as a PyTorch image batch would be
    x = jax.random.uniform(k_x, (batch, channels, height, width), jnp.float32)

    mean, logvar = vae_encoder_forward(x, prepared, meta)
    jax.block_until_ready((mean, logvar))

    assert mean.shape == (batch, z_dim)
    assert logvar.shape == (batch, z_dim)

    # numerical check vs fp32 reference (bf16 weights => loose tolerance)
    m_ref, lv_ref = _reference_forward(x.reshape(batch, -1), raw_params)
    assert jnp.allclose(mean, m_ref, atol=5e-2, rtol=5e-2), "mean mismatch"
    assert jnp.allclose(logvar, lv_ref, atol=5e-2, rtol=5e-2), "logvar mismatch"

    print("KERNEL_OK")
</pallas_src>

<mosaic_0001>
module attributes {stable_mosaic.version = 11 : i64} {
  func.func @_vae_encoder_kernel(%arg0: i32, %arg1: memref<16x1024xbf16, #tpu.memory_space<vmem>>, %arg2: memref<1024x512xbf16, #tpu.memory_space<vmem>>, %arg3: memref<1x512xf32, #tpu.memory_space<vmem>>, %arg4: memref<512x256xbf16, #tpu.memory_space<vmem>>, %arg5: memref<1x256xf32, #tpu.memory_space<vmem>>, %arg6: memref<256x128xbf16, #tpu.memory_space<vmem>>, %arg7: memref<1x128xf32, #tpu.memory_space<vmem>>, %arg8: memref<128x128xbf16, #tpu.memory_space<vmem>>, %arg9: memref<1x128xf32, #tpu.memory_space<vmem>>, %arg10: memref<16x128xf32, #tpu.memory_space<vmem>>) attributes {dimension_semantics = [#tpu.dimension_semantics<parallel>], iteration_bounds = array<i64: 1>, scalar_prefetch = 0 : i64, scratch_operands = 0 : i64, tpu.core_type = #tpu.core_type<tc>, window_params = [{transform_indices = @transform_0, window_bounds = array<i64: 16, 1024>}, {pipeline_mode = #tpu.pipeline_mode<synchronous>, transform_indices = @transform_1, window_bounds = array<i64: 1024, 512>}, {pipeline_mode = #tpu.pipeline_mode<synchronous>, transform_indices = @transform_2, window_bounds = array<i64: 1, 512>}, {pipeline_mode = #tpu.pipeline_mode<synchronous>, transform_indices = @transform_3, window_bounds = array<i64: 512, 256>}, {pipeline_mode = #tpu.pipeline_mode<synchronous>, transform_indices = @transform_4, window_bounds = array<i64: 1, 256>}, {pipeline_mode = #tpu.pipeline_mode<synchronous>, transform_indices = @transform_5, window_bounds = array<i64: 256, 128>}, {pipeline_mode = #tpu.pipeline_mode<synchronous>, transform_indices = @transform_6, window_bounds = array<i64: 1, 128>}, {pipeline_mode = #tpu.pipeline_mode<synchronous>, transform_indices = @transform_7, window_bounds = array<i64: 128, 128>}, {pipeline_mode = #tpu.pipeline_mode<synchronous>, transform_indices = @transform_8, window_bounds = array<i64: 1, 128>}, {transform_indices = @transform_9, window_bounds = array<i64: 16, 128>}]} {
    %c0 = arith.constant 0 : index
    %c0_0 = arith.constant 0 : index
    %0 = vector.load %arg1[%c0, %c0_0] : memref<16x1024xbf16, #tpu.memory_space<vmem>>, vector<16x1024xbf16>
    %c0_1 = arith.constant 0 : index
    %c0_2 = arith.constant 0 : index
    %1 = vector.load %arg2[%c0_1, %c0_2] : memref<1024x512xbf16, #tpu.memory_space<vmem>>, vector<1024x512xbf16>
    %cst = arith.constant dense<0.000000e+00> : vector<16x512xf32>
    %2 = tpu.matmul %0, %1, %cst {dimension_numbers = #tpu.dot_dimension_numbers<[1], [0], [0], [1], [0, 0, 1, 1], [], []>} : vector<16x1024xbf16>, vector<1024x512xbf16>, vector<16x512xf32> -> vector<16x512xf32>
    %c0_3 = arith.constant 0 : index
    %c0_4 = arith.constant 0 : index
    %3 = vector.load %arg3[%c0_3, %c0_4] : memref<1x512xf32, #tpu.memory_space<vmem>>, vector<1x512xf32>
    %4 = vector.broadcast %3 : vector<1x512xf32> to vector<16x512xf32>
    %5 = arith.addf %2, %4 : vector<16x512xf32>
    %cst_5 = arith.constant 0.000000e+00 : f32
    %6 = vector.broadcast %cst_5 : f32 to vector<16x512xf32>
    %7 = arith.maximumf %5, %6 : vector<16x512xf32>
    %8 = arith.truncf %7 : vector<16x512xf32> to vector<16x512xbf16>
    %c0_6 = arith.constant 0 : index
    %c0_7 = arith.constant 0 : index
    %9 = vector.load %arg4[%c0_6, %c0_7] : memref<512x256xbf16, #tpu.memory_space<vmem>>, vector<512x256xbf16>
    %cst_8 = arith.constant dense<0.000000e+00> : vector<16x256xf32>
    %10 = tpu.matmul %8, %9, %cst_8 {dimension_numbers = #tpu.dot_dimension_numbers<[1], [0], [0], [1], [0, 0, 1, 1], [], []>} : vector<16x512xbf16>, vector<512x256xbf16>, vector<16x256xf32> -> vector<16x256xf32>
    %c0_9 = arith.constant 0 : index
    %c0_10 = arith.constant 0 : index
    %11 = vector.load %arg5[%c0_9, %c0_10] : memref<1x256xf32, #tpu.memory_space<vmem>>, vector<1x256xf32>
    %12 = vector.broadcast %11 : vector<1x256xf32> to vector<16x256xf32>
    %13 = arith.addf %10, %12 : vector<16x256xf32>
    %cst_11 = arith.constant 0.000000e+00 : f32
    %14 = vector.broadcast %cst_11 : f32 to vector<16x256xf32>
    %15 = arith.maximumf %13, %14 : vector<16x256xf32>
    %16 = arith.truncf %15 : vector<16x256xf32> to vector<16x256xbf16>
    %c0_12 = arith.constant 0 : index
    %c0_13 = arith.constant 0 : index
    %17 = vector.load %arg6[%c0_12, %c0_13] : memref<256x128xbf16, #tpu.memory_space<vmem>>, vector<256x128xbf16>
    %cst_14 = arith.constant dense<0.000000e+00> : vector<16x128xf32>
    %18 = tpu.matmul %16, %17, %cst_14 {dimension_numbers = #tpu.dot_dimension_numbers<[1], [0], [0], [1], [0, 0, 1, 1], [], []>} : vector<16x256xbf16>, vector<256x128xbf16>, vector<16x128xf32> -> vector<16x128xf32>
    %c0_15 = arith.constant 0 : index
    %c0_16 = arith.constant 0 : index
    %19 = vector.load %arg7[%c0_15, %c0_16] : memref<1x128xf32, #tpu.memory_space<vmem>>, vector<1x128xf32>
    %20 = vector.broadcast %19 : vector<1x128xf32> to vector<16x128xf32>
    %21 = arith.addf %18, %20 : vector<16x128xf32>
    %cst_17 = arith.constant 0.000000e+00 : f32
    %22 = vector.broadcast %cst_17 : f32 to vector<16x128xf32>
    %23 = arith.maximumf %21, %22 : vector<16x128xf32>
    %24 = arith.truncf %23 : vector<16x128xf32> to vector<16x128xbf16>
    %c0_18 = arith.constant 0 : index
    %c0_19 = arith.constant 0 : index
    %25 = vector.load %arg8[%c0_18, %c0_19] : memref<128x128xbf16, #tpu.memory_space<vmem>>, vector<128x128xbf16>
    %cst_20 = arith.constant dense<0.000000e+00> : vector<16x128xf32>
    %26 = tpu.matmul %24, %25, %cst_20 {dimension_numbers = #tpu.dot_dimension_numbers<[1], [0], [0], [1], [0, 0, 1, 1], [], []>} : vector<16x128xbf16>, vector<128x128xbf16>, vector<16x128xf32> -> vector<16x128xf32>
    %c0_21 = arith.constant 0 : index
    %c0_22 = arith.constant 0 : index
    %27 = vector.load %arg9[%c0_21, %c0_22] : memref<1x128xf32, #tpu.memory_space<vmem>>, vector<1x128xf32>
    %28 = vector.broadcast %27 : vector<1x128xf32> to vector<16x128xf32>
    %29 = arith.addf %26, %28 : vector<16x128xf32>
    %c0_23 = arith.constant 0 : index
    %c0_24 = arith.constant 0 : index
    %30 = vector.load %arg10[%c0_23, %c0_24] : memref<16x128xf32, #tpu.memory_space<vmem>>, vector<16x128xf32>
    tpu.vector_store %arg10[%c0_23, %c0_24], %29 {strides = array<i32>} : memref<16x128xf32, #tpu.memory_space<vmem>>, vector<16x128xf32>,
    return
  }
  func.func @transform_0(%arg0: i32) -> (i32, i32) {
    %c0_i32 = arith.constant 0 : i32
    %c0_i32_0 = arith.constant 0 : i32
    return %arg0, %c0_i32 : i32, i32
  }
  func.func @transform_1(%arg0: i32) -> (i32, i32) {
    %c0_i32 = arith.constant 0 : i32
    %c0_i32_0 = arith.constant 0 : i32
    %c0_i32_1 = arith.constant 0 : i32
    return %c0_i32, %c0_i32_0 : i32, i32
  }
  func.func @transform_2(%arg0: i32) -> (i32, i32) {
    %c0_i32 = arith.constant 0 : i32
    %c0_i32_0 = arith.constant 0 : i32
    %c0_i32_1 = arith.constant 0 : i32
    return %c0_i32, %c0_i32_0 : i32, i32
  }
  func.func @transform_3(%arg0: i32) -> (i32, i32) {
    %c0_i32 = arith.constant 0 : i32
    %c0_i32_0 = arith.constant 0 : i32
    %c0_i32_1 = arith.constant 0 : i32
    return %c0_i32, %c0_i32_0 : i32, i32
  }
  func.func @transform_4(%arg0: i32) -> (i32, i32) {
    %c0_i32 = arith.constant 0 : i32
    %c0_i32_0 = arith.constant 0 : i32
    %c0_i32_1 = arith.constant 0 : i32
    return %c0_i32, %c0_i32_0 : i32, i32
  }
  func.func @transform_5(%arg0: i32) -> (i32, i32) {
    %c0_i32 = arith.constant 0 : i32
    %c0_i32_0 = arith.constant 0 : i32
    %c0_i32_1 = arith.constant 0 : i32
    return %c0_i32, %c0_i32_0 : i32, i32
  }
  func.func @transform_6(%arg0: i32) -> (i32, i32) {
    %c0_i32 = arith.constant 0 : i32
    %c0_i32_0 = arith.constant 0 : i32
    %c0_i32_1 = arith.constant 0 : i32
    return %c0_i32, %c0_i32_0 : i32, i32
  }
  func.func @transform_7(%arg0: i32) -> (i32, i32) {
    %c0_i32 = arith.constant 0 : i32
    %c0_i32_0 = arith.constant 0 : i32
    %c0_i32_1 = arith.constant 0 : i32
    return %c0_i32, %c0_i32_0 : i32, i32
  }
  func.func @transform_8(%arg0: i32) -> (i32, i32) {
    %c0_i32 = arith.constant 0 : i32
    %c0_i32_0 = arith.constant 0 : i32
    %c0_i32_1 = arith.constant 0 : i32
    return %c0_i32, %c0_i32_0 : i32, i32
  }
  func.func @transform_9(%arg0: i32) -> (i32, i32) {
    %c0_i32 = arith.constant 0 : i32
    %c0_i32_0 = arith.constant 0 : i32
    return %arg0, %c0_i32 : i32, i32
  }
}

</mosaic_0001>

<bundles_post_ra>
// kernel: tpu_custom_call.1
= control target key start
LH: loop header
LB: loop body
LE: loop exit
PB: predicated region body
PF: predicated region fallthrough
CT: control target
= control target key end

     0   :  { %14 = vsyncpa [#allocation3], 0  ;;  %s5122_s0 = inlined_call_operand.hbm [shape: bf16[16,1024], index: 0, kind: input, shape index: {}]   ;;  %s5123_s1 = inlined_call_operand.hbm [shape: bf16[1024,512], index: 1, kind: input, shape index: {}]   ;;  %s5124_s2 = inlined_call_operand.hbm [shape: f32[1,512], index: 2, kind: input, shape index: {}]   ;;  %s5125_s3 = inlined_call_operand.hbm [shape: bf16[512,256], index: 3, kind: input, shape index: {}]   ;;  %s5126_s4 = inlined_call_operand.vmem [shape: f32[1,256], index: 4, kind: input, shape index: {}]   ;;  %s5127_s5 = inlined_call_operand.hbm [shape: bf16[256,128], index: 5, kind: input, shape index: {}]   ;;  %s5128_s6 = inlined_call_operand.vmem [shape: f32[1,128], index: 6, kind: input, shape index: {}]   ;;  %s5129_s7 = inlined_call_operand.hbm [shape: bf16[128,128], index: 7, kind: input, shape index: {}]   ;;  %s5130_s8 = inlined_call_operand.vmem [shape: f32[1,128], index: 8, kind: input, shape index: {}]   ;;  %s5131_s9 = inlined_call_operand.hbm [shape: f32[16,128], index: 9, kind: output, shape index: {}]  }
   0x1   :  { %15 = vsyncpa [#allocation6], 0 }
   0x2   :  { %16 = vsyncpa [#allocation9], 0 }
   0x3   :  { %17 = vsyncpa [#allocation12], 0  ;;  %s36_s11 = sshll.u32 %s5123_s1, 4  ;;  %s37_s11 = int_to_ptr.hbm [resolvable:$true] %s36_s11 }
   0x4   :  { %18 = vsyncpa [#allocation4], 0  ;;  %s4911_s12 = smov [#allocation5]   ;;  %s60_s16 = sshll.u32 %s5125_s3, 4  ;;  %s61_s16 = int_to_ptr.hbm [resolvable:$true] %s60_s16 }
   0x5   :  { %s38_s13 = sshll.u32 %s4911_s12, 4  ;;  %s4912_s17 = smov 256   ;;  %s39_s13 = int_to_ptr.vmem [resolvable:$true] %s38_s13 }
   0x6   :  { %s4913_s18 = smov 16   ;;  %s4914_s19 = smov [#allocation8]  }
   0x7   :  { %44 = dma.hbm_to_vmem [thread:$0]  %s37_s11, 32768, %s39_s13, [#allocation6], %s4912_s17, %s4912_s17, %s4913_s18  }
   0x8   :  { %s62_s20 = sshll.u32 %s4914_s19, 4  ;;  %s4915_s21 = smov 128   ;;  %s63_s20 = int_to_ptr.vmem [resolvable:$true] %s62_s20 }
   0x9   :  { %s4916_s22 = smov 8   ;;  %s23_s24 = sshll.u32 %s5122_s0, 4  ;;  %s24_s24 = int_to_ptr.hbm [resolvable:$true] %s23_s24 }
   0xa   :  { %68 = dma.hbm_to_vmem [thread:$0]  %s61_s16, 8192, %s63_s20, [#allocation9], %s4915_s21, %s4915_s21, %s4916_s22  }
   0xb   :  { %s4917_s25 = smov [#allocation2]   ;;  %s50_s28 = sshll.u32 %s5124_s2, 4  ;;  %s51_s28 = int_to_ptr.hbm [resolvable:$true] %s50_s28 }
   0xc   :  { %s25_s3 = sshll.u32 %s4917_s25, 4  ;;  %s4918_s29 = smov 512   ;;  %s26_s3 = int_to_ptr.vmem [resolvable:$true] %s25_s3 }
   0xd   :  { %s4919_s30 = smov 32   ;;  %s4920_s10 = smov [#allocation7]  }
   0xe   :  { %31 = dma.hbm_to_vmem [thread:$0]  %s24_s24, 1024, %s26_s3, [#allocation3], %s4918_s29, %s4918_s29, %s4919_s30  }
   0xf   :  { %s52_s11 = sshll.u32 %s4920_s10, 4  ;;  %s75_s14 = sshll.u32 %s5127_s5, 4  ;;  %s53_s11 = int_to_ptr.vmem [resolvable:$true] %s52_s11  ;;  %s76_s14 = int_to_ptr.hbm [resolvable:$true] %s75_s14 }
  0x10   :  { %55 = dma.hbm_to_vmem [thread:$0]  %s51_s28, 64, %s53_s11, [#allocation6]  }
  0x11   :  { %s4921_s0 = smov [#allocation10]   ;;  %s90_s2 = sshll.u32 %s5129_s7, 4  ;;  %s91_s2 = int_to_ptr.hbm [resolvable:$true] %s90_s2 }
  0x12   :  { %s77_s15 = sshll.u32 %s4921_s0, 4  ;;  %s4922_s18 = smov 64   ;;  %s78_s15 = int_to_ptr.vmem [resolvable:$true] %s77_s15 }
  0x13   :  { %s4923_s19 = smov 4   ;;  %s4924_s20 = smov [#allocation11]  }
  0x14   :  { %83 = dma.hbm_to_vmem [thread:$0]  %s76_s14, 2048, %s78_s15, [#allocation9], %s4922_s18, %s4922_s18, %s4923_s19  }
  0x15   :  { %s92_s1 = sshll.u32 %s4924_s20, 4  ;;  %s93_s1 = int_to_ptr.vmem [resolvable:$true] %s92_s1 }
  0x16   :  { %98 = dma.hbm_to_vmem [thread:$0]  %s91_s2, 1024, %s93_s1, [#allocation12], %s4922_s18, %s4922_s18, %s4923_s19  }
  0x17   :  { %4901 = dma.done.wait [#allocation3], 1024  }
  0x18   :  { %4902 = vsyncadd [#allocation3], 4294966272 }
  0x19   :  { %4903 = dma.done.wait [#allocation6], 32832  }
  0x1a   :  { %4904 = vsyncadd [#allocation6], 4294934464 }
  0x1b   :  { %4905 = dma.done.wait [#allocation9], 10240  }
  0x1c   :  { %4906 = vsyncadd [#allocation9], 4294957056 }
  0x1d   :  { %4907 = dma.done.wait [#allocation12], 1024  }
  0x1e   :  { %4908 = vsyncadd [#allocation12], 4294966272  ;;  %v3102_v0 = vld [vmem:[#allocation5 + $0xe0] sm:$0xf]  ;;  %v4402_v1 = vld [vmem:[#allocation5 + $0xec] sm:$0xf0] }
  0x1f   :  { %v3230_v2 = vld [vmem:[#allocation5 + $0x1e0] sm:$0xf]  ;;  %v3103_v3 = vor.u32 %v4402_v1, %v3102_v0  ;;  %v4434_v4 = vld [vmem:[#allocation5 + $0x1ec] sm:$0xf0]  ;;  %s4925_s3 = smov [#allocation13]   ;;  %s2940_s28 = sshll.u32 %s5131_s9, 4  ;;  %s2941_s28 = int_to_ptr.hbm [resolvable:$true] %s2940_s28 }
  0x20   :  { %v3358_v5 = vld [vmem:[#allocation5 + $0x2e0] sm:$0xf]  ;;  %v4466_v6 = vld [vmem:[#allocation5 + $0x2ec] sm:$0xf0]  ;;  %v3231_v7 = vor.u32 %v4434_v4, %v3230_v2  ;;  %s2938_s26 = sshll.u32 %s4925_s3, 4  ;;  %s2939_s26 = int_to_ptr.vmem [resolvable:$true] %s2938_s26 }
  0x21   :  { %v3359_v8 = vor.u32 %v4466_v6, %v3358_v5  ;;  %v3486_v9 = vld [vmem:[#allocation5 + $0x3e0] sm:$0xf]  ;;  %v4498_v10 = vld [vmem:[#allocation5 + $0x3ec] sm:$0xf0]  ;;  %1719 = vmatpush.bf16.msra.mxu0 %v3103_v3 }
  0x22   :  { %v3086_v11 = vld [vmem:[#allocation5 + $0xc0] sm:$0xf]  ;;  %v3487_v12 = vor.u32 %v4498_v10, %v3486_v9  ;;  %v4398_v13 = vld [vmem:[#allocation5 + $0xcc] sm:$0xf0]  ;;  %1733 = vmatpush.bf16.msra.mxu1 %v3231_v7 }
  0x23   :  { %v3214_v14 = vld [vmem:[#allocation5 + $0x1c0] sm:$0xf]  ;;  %v4430_v15 = vld [vmem:[#allocation5 + $0x1cc] sm:$0xf0]  ;;  %1747 = vmatpush.bf16.msra.mxu2 %v3359_v8  ;;  %v3087_v16 = vor.u32 %v4398_v13, %v3086_v11 }
  0x24   :  { %v3215_v17 = vor.u32 %v4430_v15, %v3214_v14  ;;  %v3342_v18 = vld [vmem:[#allocation5 + $0x2c0] sm:$0xf]  ;;  %v4462_v19 = vld [vmem:[#allocation5 + $0x2cc] sm:$0xf0]  ;;  %1761 = vmatpush.bf16.msra.mxu3 %v3487_v12 }
  0x25   :  { %v3470_v20 = vld [vmem:[#allocation5 + $0x3c0] sm:$0xf]  ;;  %v3343_v21 = vor.u32 %v4462_v19, %v3342_v18  ;;  %v4494_v22 = vld [vmem:[#allocation5 + $0x3cc] sm:$0xf0]  ;;  %1720 = vmatpush.bf16.msra.mxu0 %v3087_v16 }
  0x26   :  { %v3070_v23 = vld [vmem:[#allocation5 + $0xa0] sm:$0xf]  ;;  %v4394_v24 = vld [vmem:[#allocation5 + $0xac] sm:$0xf0]  ;;  %v3471_v25 = vor.u32 %v4494_v22, %v3470_v20  ;;  %1734 = vmatpush.bf16.msra.mxu1 %v3215_v17 }
  0x27   :  { %v3198_v26 = vld [vmem:[#allocation5 + $0x1a0] sm:$0xf]  ;;  %v4426_v27 = vld [vmem:[#allocation5 + $0x1ac] sm:$0xf0]  ;;  %v3071_v29 = vor.u32 %v4394_v24, %v3070_v23  ;;  %1748 = vmatpush.bf16.msra.mxu2 %v3343_v21 }
  0x28   :  { %v3326_v28 = vld [vmem:[#allocation5 + $0x2a0] sm:$0xf]  ;;  %v4458_v30 = vld [vmem:[#allocation5 + $0x2ac] sm:$0xf0]  ;;  %v3199_v33 = vor.u32 %v4426_v27, %v3198_v26  ;;  %1762 = vmatpush.bf16.msra.mxu3 %v3471_v25 }
  0x29   :  { %v3454_v31 = vld [vmem:[#allocation5 + $0x3a0] sm:$0xf]  ;;  %v4490_v32 = vld [vmem:[#allocation5 + $0x3ac] sm:$0xf0]  ;;  %v3327_v34 = vor.u32 %v4458_v30, %v3326_v28  ;;  %1721 = vmatpush.bf16.msra.mxu0 %v3071_v29 }
  0x2a   :  { %v3054_v35 = vld [vmem:[#allocation5 + $0x80] sm:$0xf]  ;;  %v4390_v36 = vld [vmem:[#allocation5 + $0x8c] sm:$0xf0]  ;;  %v3455_v38 = vor.u32 %v4490_v32, %v3454_v31  ;;  %1735 = vmatpush.bf16.msra.mxu1 %v3199_v33 }
  0x2b   :  { %v3182_v37 = vld [vmem:[#allocation5 + $0x180] sm:$0xf]  ;;  %v4422_v39 = vld [vmem:[#allocation5 + $0x18c] sm:$0xf0]  ;;  %v3055_v44 = vor.u32 %v4390_v36, %v3054_v35  ;;  %1749 = vmatpush.bf16.msra.mxu2 %v3327_v34 }
  0x2c   :  { %v3310_v40 = vld [vmem:[#allocation5 + $0x280] sm:$0xf]  ;;  %v4454_v41 = vld [vmem:[#allocation5 + $0x28c] sm:$0xf0]  ;;  %v3183_v45 = vor.u32 %v4422_v39, %v3182_v37  ;;  %1763 = vmatpush.bf16.msra.mxu3 %v3455_v38 }
  0x2d   :  { %v3438_v42 = vld [vmem:[#allocation5 + $0x380] sm:$0xf]  ;;  %v4486_v43 = vld [vmem:[#allocation5 + $0x38c] sm:$0xf0]  ;;  %v3311_v46 = vor.u32 %v4454_v41, %v3310_v40  ;;  %1722 = vmatpush.bf16.msra.mxu0 %v3055_v44 }
  0x2e   :  { %v3038_v47 = vld [vmem:[#allocation5 + $0x60] sm:$0xf]  ;;  %v4386_v48 = vld [vmem:[#allocation5 + $0x6c] sm:$0xf0]  ;;  %v3439_v50 = vor.u32 %v4486_v43, %v3438_v42  ;;  %1736 = vmatpush.bf16.msra.mxu1 %v3183_v45 }
  0x2f   :  { %v3166_v49 = vld [vmem:[#allocation5 + $0x160] sm:$0xf]  ;;  %v4418_v51 = vld [vmem:[#allocation5 + $0x16c] sm:$0xf0]  ;;  %v3039_v56 = vor.u32 %v4386_v48, %v3038_v47  ;;  %1750 = vmatpush.bf16.msra.mxu2 %v3311_v46 }
  0x30   :  { %v3294_v52 = vld [vmem:[#allocation5 + $0x260] sm:$0xf]  ;;  %v4450_v53 = vld [vmem:[#allocation5 + $0x26c] sm:$0xf0]  ;;  %v3167_v57 = vor.u32 %v4418_v51, %v3166_v49  ;;  %1764 = vmatpush.bf16.msra.mxu3 %v3439_v50 }
  0x31   :  { %v3422_v54 = vld [vmem:[#allocation5 + $0x360] sm:$0xf]  ;;  %v4482_v55 = vld [vmem:[#allocation5 + $0x36c] sm:$0xf0]  ;;  %v3295_v58 = vor.u32 %v4450_v53, %v3294_v52  ;;  %1723 = vmatpush.bf16.msra.mxu0 %v3039_v56 }
  0x32   :  { %v3022_v59 = vld [vmem:[#allocation5 + $0x40] sm:$0xf]  ;;  %v4382_v60 = vld [vmem:[#allocation5 + $0x4c] sm:$0xf0]  ;;  %v3423_v62 = vor.u32 %v4482_v55, %v3422_v54  ;;  %1737 = vmatpush.bf16.msra.mxu1 %v3167_v57  ;;  %v2966_v54 = vld [vmem:[#allocation2 + $0x8] sm:$0xf] }
  0x33   :  { %v3150_v61 = vld [vmem:[#allocation5 + $0x140] sm:$0xf]  ;;  %v4414_v63 = vld [vmem:[#allocation5 + $0x14c] sm:$0xf0]  ;;  %v3023_v4 = vor.u32 %v4382_v60, %v3022_v59  ;;  %1751 = vmatpush.bf16.msra.mxu2 %v3295_v58  ;;  %v4369_v59 = vld [vmem:[#allocation2 + $0x24] sm:$0xf0] }
  0x34   :  { %v3278_v0 = vld [vmem:[#allocation5 + $0x240] sm:$0xf]  ;;  %v4446_v1 = vld [vmem:[#allocation5 + $0x24c] sm:$0xf0]  ;;  %v3151_v5 = vor.u32 %v4414_v63, %v3150_v61  ;;  %1765 = vmatpush.bf16.msra.mxu3 %v3423_v62 }
  0x35   :  { %v3406_v2 = vld [vmem:[#allocation5 + $0x340] sm:$0xf]  ;;  %v4478_v3 = vld [vmem:[#allocation5 + $0x34c] sm:$0xf0]  ;;  %v3279_v6 = vor.u32 %v4446_v1, %v3278_v0  ;;  %1724 = vmatpush.bf16.msra.mxu0 %v3023_v4  ;;  %v4999_v1 = vor.u32 %v4369_v59, %v2966_v54 }
  0x36   :  { %v3006_v7 = vld [vmem:[#allocation5 + $0x20] sm:$0xf]  ;;  %v4378_v8 = vld [vmem:[#allocation5 + $0x2c] sm:$0xf0]  ;;  %v3407_v10 = vor.u32 %v4478_v3, %v3406_v2  ;;  %1738 = vmatpush.bf16.msra.mxu1 %v3151_v5 }
  0x37   :  { %v3134_v9 = vld [vmem:[#allocation5 + $0x120] sm:$0xf]  ;;  %v4410_v11 = vld [vmem:[#allocation5 + $0x12c] sm:$0xf0]  ;;  %v3007_v16 = vor.u32 %v4378_v8, %v3006_v7  ;;  %1752 = vmatpush.bf16.msra.mxu2 %v3279_v6  ;;  %v4364_v6 = vld [vmem:[#allocation2 + $0x4] sm:$0xf] }
  0x38   :  { %v3262_v12 = vld [vmem:[#allocation5 + $0x220] sm:$0xf]  ;;  %v4442_v13 = vld [vmem:[#allocation5 + $0x22c] sm:$0xf0]  ;;  %v3135_v19 = vor.u32 %v4410_v11, %v3134_v9  ;;  %1766 = vmatpush.bf16.msra.mxu3 %v3407_v10  ;;  %v2960_v7 = vld [vmem:[#allocation2 + $0x20] sm:$0xf0] }
  0x39   :  { %v3390_v14 = vld [vmem:[#allocation5 + $0x320] sm:$0xf]  ;;  %v4474_v15 = vld [vmem:[#allocation5 + $0x32c] sm:$0xf0]  ;;  %v3263_v20 = vor.u32 %v4442_v13, %v3262_v12  ;;  %1725 = vmatpush.bf16.msra.mxu0 %v3007_v16  ;;  %v4365_v8 = vld [vmem:[#allocation2 + $0xc] sm:$0xf]  ;;  %v5003_v10 = vor.u32 %v4364_v6, %v2960_v7 }
  0x3a   :  { %v2990_v17 = vld [vmem:[#allocation5] sm:$0xf]  ;;  %v4374_v18 = vld [vmem:[#allocation5 + $0xc] sm:$0xf0]  ;;  %v3391_v24 = vor.u32 %v4474_v15, %v3390_v14  ;;  %1739 = vmatpush.bf16.msra.mxu1 %v3135_v19  ;;  %v2968_v11 = vld [vmem:[#allocation2 + $0x28] sm:$0xf0] }
  0x3b   :  { %v3118_v21 = vld [vmem:[#allocation5 + $0x100] sm:$0xf]  ;;  %v4406_v22 = vld [vmem:[#allocation5 + $0x10c] sm:$0xf0]  ;;  %v2991_v31 = vor.u32 %v4374_v18, %v2990_v17  ;;  %1753 = vmatpush.bf16.msra.mxu2 %v3263_v20  ;;  %v5005_v17 = vor.u32 %v4365_v8, %v2968_v11 }
  0x3c   :  { %v3246_v23 = vld [vmem:[#allocation5 + $0x200] sm:$0xf]  ;;  %v4438_v25 = vld [vmem:[#allocation5 + $0x20c] sm:$0xf0]  ;;  %v3119_v35 = vor.u32 %v4406_v22, %v3118_v21  ;;  %1767 = vmatpush.bf16.msra.mxu3 %v3391_v24 }
  0x3d   :  { %v3374_v26 = vld [vmem:[#allocation5 + $0x300] sm:$0xf]  ;;  %v4470_v27 = vld [vmem:[#allocation5 + $0x30c] sm:$0xf0]  ;;  %v3247_v36 = vor.u32 %v4438_v25, %v3246_v23  ;;  %1726 = vmatpush.bf16.msra.mxu0 %v2991_v31 }
  0x3e   :  { %v3614_v28 = vld [vmem:[#allocation5 + $0x4e0] sm:$0xf]  ;;  %v4530_v29 = vld [vmem:[#allocation5 + $0x4ec] sm:$0xf0]  ;;  %v3375_v39 = vor.u32 %v4470_v27, %v3374_v26  ;;  %1740 = vmatpush.bf16.msra.mxu1 %v3119_v35 }
  0x3f   :  { %v3742_v30 = vld [vmem:[#allocation5 + $0x5e0] sm:$0xf]  ;;  %v4562_v32 = vld [vmem:[#allocation5 + $0x5ec] sm:$0xf0]  ;;  %v3615_v40 = vor.u32 %v4530_v29, %v3614_v28  ;;  %1754 = vmatpush.bf16.msra.mxu2 %v3247_v36 }
  0x40   :  { %v3870_v33 = vld [vmem:[#allocation5 + $0x6e0] sm:$0xf]  ;;  %v4594_v34 = vld [vmem:[#allocation5 + $0x6ec] sm:$0xf0]  ;;  %v3743_v43 = vor.u32 %v4562_v32, %v3742_v30  ;;  %1768 = vmatpush.bf16.msra.mxu3 %v3375_v39 }
  0x41   :  { %v3998_v37 = vld [vmem:[#allocation5 + $0x7e0] sm:$0xf]  ;;  %v4626_v38 = vld [vmem:[#allocation5 + $0x7ec] sm:$0xf0]  ;;  %v3871_v44 = vor.u32 %v4594_v34, %v3870_v33  ;;  %1775 = vmatpush.bf16.msrb.mxu0 %v3615_v40  ;;  %1741 = vmatmul.bf16.vlgmr.msra.gmra.mxu1 %v5003_v10 }
  0x42   :  { %v3598_v41 = vld [vmem:[#allocation5 + $0x4c0] sm:$0xf]  ;;  %v4526_v42 = vld [vmem:[#allocation5 + $0x4cc] sm:$0xf0]  ;;  %v3999_v48 = vor.u32 %v4626_v38, %v3998_v37  ;;  %1789 = vmatpush.bf16.msrb.mxu1 %v3743_v43  ;;  %1755 = vmatmul.bf16.vlgmr.msra.gmra.mxu2 %v4999_v1 }
  0x43   :  { %v3726_v45 = vld [vmem:[#allocation5 + $0x5c0] sm:$0xf]  ;;  %v4558_v46 = vld [vmem:[#allocation5 + $0x5cc] sm:$0xf0]  ;;  %v3599_v55 = vor.u32 %v4526_v42, %v3598_v41  ;;  %1803 = vmatpush.bf16.msrb.mxu2 %v3871_v44  ;;  %1769 = vmatmul.bf16.vlgmr.msra.gmra.mxu3 %v5005_v17 }
  0x44   :  { %v3854_v47 = vld [vmem:[#allocation5 + $0x6c0] sm:$0xf]  ;;  %v4590_v49 = vld [vmem:[#allocation5 + $0x6cc] sm:$0xf0]  ;;  %v3727_v60 = vor.u32 %v4558_v46, %v3726_v45  ;;  %1817 = vmatpush.bf16.msrb.mxu3 %v3999_v48 }
  0x45   :  { %v3982_v50 = vld [vmem:[#allocation5 + $0x7c0] sm:$0xf]  ;;  %v4622_v51 = vld [vmem:[#allocation5 + $0x7cc] sm:$0xf0]  ;;  %v3855_v61 = vor.u32 %v4590_v49, %v3854_v47  ;;  %1776 = vmatpush.bf16.msrb.mxu0 %v3599_v55 }
  0x46   :  { %v2958_v52 = vld [vmem:[#allocation2] sm:$0xf]  ;;  %v4522_v57 = vld [vmem:[#allocation5 + $0x4ac] sm:$0xf0]  ;;  %v3983_v2 = vor.u32 %v4622_v51, %v3982_v50  ;;  %1790 = vmatpush.bf16.msrb.mxu1 %v3727_v60 }
  0x47   :  { %v4368_v53 = vld [vmem:[#allocation2 + $0x1c] sm:$0xf0]  ;;  %v4554_v63 = vld [vmem:[#allocation5 + $0x5ac] sm:$0xf0]  ;;  %1804 = vmatpush.bf16.msrb.mxu2 %v3855_v61 }
  0x48   :  { %v3582_v56 = vld [vmem:[#allocation5 + $0x4a0] sm:$0xf]  ;;  %v4997_v58 = vor.u32 %v4368_v53, %v2958_v52  ;;  %v4586_v3 = vld [vmem:[#allocation5 + $0x6ac] sm:$0xf0]  ;;  %1818 = vmatpush.bf16.msrb.mxu3 %v3983_v2 }
  0x49   :  { %v3710_v62 = vld [vmem:[#allocation5 + $0x5a0] sm:$0xf]  ;;  %v4618_v5 = vld [vmem:[#allocation5 + $0x7ac] sm:$0xf0]  ;;  %v3583_v9 = vor.u32 %v4522_v57, %v3582_v56 }
  0x4a   :  { %v3838_v0 = vld [vmem:[#allocation5 + $0x6a0] sm:$0xf]  ;;  %1727 = vmatmul.bf16.vlgmr.msra.gmra.mxu0 %v4997_v58  ;;  %v3711_v12 = vor.u32 %v4554_v63, %v3710_v62  ;;  %v4518_v15 = vld [vmem:[#allocation5 + $0x48c] sm:$0xf0] }
  0x4b   :  { %v3966_v4 = vld [vmem:[#allocation5 + $0x7a0] sm:$0xf]  ;;  %v3839_v13 = vor.u32 %v4586_v3, %v3838_v0  ;;  %v4550_v19 = vld [vmem:[#allocation5 + $0x58c] sm:$0xf0]  ;;  %1777 = vmatpush.bf16.msrb.mxu0 %v3583_v9  ;;  %v4400_v9 = vld [vmem:[#allocation5 + $0xe4] sm:$0xf] }
  0x4c   :  { %v3566_v14 = vld [vmem:[#allocation5 + $0x480] sm:$0xf]  ;;  %v3967_v18 = vor.u32 %v4618_v5, %v3966_v4  ;;  %v4582_v21 = vld [vmem:[#allocation5 + $0x68c] sm:$0xf0]  ;;  %1791 = vmatpush.bf16.msrb.mxu1 %v3711_v12  ;;  %v3104_v12 = vld [vmem:[#allocation5 + $0xf0] sm:$0xf0] }
  0x4d   :  { %v3694_v16 = vld [vmem:[#allocation5 + $0x580] sm:$0xf]  ;;  %v4614_v23 = vld [vmem:[#allocation5 + $0x78c] sm:$0xf0]  ;;  %v3567_v24 = vor.u32 %v4518_v15, %v3566_v14  ;;  %1805 = vmatpush.bf16.msrb.mxu2 %v3839_v13  ;;  %v4432_v13 = vld [vmem:[#allocation5 + $0x1e4] sm:$0xf] }
  0x4e   :  { %v3822_v20 = vld [vmem:[#allocation5 + $0x680] sm:$0xf]  ;;  %v3695_v25 = vor.u32 %v4550_v19, %v3694_v16  ;;  %v4514_v28 = vld [vmem:[#allocation5 + $0x46c] sm:$0xf0]  ;;  %1819 = vmatpush.bf16.msrb.mxu3 %v3967_v18  ;;  %v3232_v14 = vld [vmem:[#allocation5 + $0x1f0] sm:$0xf0] }
  0x4f   :  { %v3950_v22 = vld [vmem:[#allocation5 + $0x780] sm:$0xf]  ;;  %v3823_v26 = vor.u32 %v4582_v21, %v3822_v20  ;;  %v4546_v31 = vld [vmem:[#allocation5 + $0x56c] sm:$0xf0]  ;;  %1778 = vmatpush.bf16.msrb.mxu0 %v3567_v24  ;;  %v4464_v15 = vld [vmem:[#allocation5 + $0x2e4] sm:$0xf] }
  0x50   :  { %v3550_v27 = vld [vmem:[#allocation5 + $0x460] sm:$0xf]  ;;  %v3951_v30 = vor.u32 %v4614_v23, %v3950_v22  ;;  %v4578_v33 = vld [vmem:[#allocation5 + $0x66c] sm:$0xf0]  ;;  %1792 = vmatpush.bf16.msrb.mxu1 %v3695_v25  ;;  %v3360_v16 = vld [vmem:[#allocation5 + $0x2f0] sm:$0xf0] }
  0x51   :  { %v3678_v29 = vld [vmem:[#allocation5 + $0x560] sm:$0xf]  ;;  %v4610_v35 = vld [vmem:[#allocation5 + $0x76c] sm:$0xf0]  ;;  %v3551_v36 = vor.u32 %v4514_v28, %v3550_v27  ;;  %1806 = vmatpush.bf16.msrb.mxu2 %v3823_v26  ;;  %v4496_v18 = vld [vmem:[#allocation5 + $0x3e4] sm:$0xf] }
  0x52   :  { %v3806_v32 = vld [vmem:[#allocation5 + $0x660] sm:$0xf]  ;;  %v3679_v37 = vor.u32 %v4546_v31, %v3678_v29  ;;  %v4510_v40 = vld [vmem:[#allocation5 + $0x44c] sm:$0xf0]  ;;  %1820 = vmatpush.bf16.msrb.mxu3 %v3951_v30  ;;  %v3488_v20 = vld [vmem:[#allocation5 + $0x3f0] sm:$0xf0]  ;;  %v3107_v29 = vor.u32 %v4400_v9, %v3104_v12 }
  0x53   :  { %v3934_v34 = vld [vmem:[#allocation5 + $0x760] sm:$0xf]  ;;  %v3807_v38 = vor.u32 %v4578_v33, %v3806_v32  ;;  %v4542_v43 = vld [vmem:[#allocation5 + $0x54c] sm:$0xf0]  ;;  %1779 = vmatpush.bf16.msrb.mxu0 %v3551_v36  ;;  %v2982_v25 = vld [vmem:[#allocation2 + $0x18] sm:$0xf]  ;;  %v3235_v33 = vor.u32 %v4432_v13, %v3232_v14 }
  0x54   :  { %v3534_v39 = vld [vmem:[#allocation5 + $0x440] sm:$0xf]  ;;  %v3935_v42 = vor.u32 %v4610_v35, %v3934_v34  ;;  %v4574_v45 = vld [vmem:[#allocation5 + $0x64c] sm:$0xf0]  ;;  %1793 = vmatpush.bf16.msrb.mxu1 %v3679_v37  ;;  %v4371_v26 = vld [vmem:[#allocation2 + $0x34] sm:$0xf0]  ;;  %v3363_v34 = vor.u32 %v4464_v15, %v3360_v16 }
  0x55   :  { %v3662_v41 = vld [vmem:[#allocation5 + $0x540] sm:$0xf]  ;;  %v4606_v47 = vld [vmem:[#allocation5 + $0x74c] sm:$0xf0]  ;;  %v3535_v48 = vor.u32 %v4510_v40, %v3534_v39  ;;  %1807 = vmatpush.bf16.msrb.mxu2 %v3807_v38  ;;  %v4366_v27 = vld [vmem:[#allocation2 + $0x14] sm:$0xf]  ;;  %v3491_v38 = vor.u32 %v4496_v18, %v3488_v20 }
  0x56   :  { %v3790_v44 = vld [vmem:[#allocation5 + $0x640] sm:$0xf]  ;;  %v3663_v50 = vor.u32 %v4542_v43, %v3662_v41  ;;  %v4506_v52 = vld [vmem:[#allocation5 + $0x42c] sm:$0xf0]  ;;  %1821 = vmatpush.bf16.msrb.mxu3 %v3935_v42  ;;  %v2976_v30 = vld [vmem:[#allocation2 + $0x30] sm:$0xf0]  ;;  %v5011_v43 = vor.u32 %v4371_v26, %v2982_v25 }
  0x57   :  { %v3918_v46 = vld [vmem:[#allocation5 + $0x740] sm:$0xf]  ;;  %v3791_v51 = vor.u32 %v4574_v45, %v3790_v44  ;;  %v4538_v54 = vld [vmem:[#allocation5 + $0x52c] sm:$0xf0]  ;;  %1780 = vmatpush.bf16.msrb.mxu0 %v3535_v48  ;;  %v4367_v31 = vld [vmem:[#allocation2 + $0x1c] sm:$0xf]  ;;  %v5013_v44 = vor.u32 %v4366_v27, %v2976_v30 }
  0x58   :  { %v3518_v49 = vld [vmem:[#allocation5 + $0x420] sm:$0xf]  ;;  %v3919_v55 = vor.u32 %v4606_v47, %v3918_v46  ;;  %v4570_v57 = vld [vmem:[#allocation5 + $0x62c] sm:$0xf0]  ;;  %1794 = vmatpush.bf16.msrb.mxu1 %v3663_v50  ;;  %v2984_v32 = vld [vmem:[#allocation2 + $0x38] sm:$0xf0] }
  0x59   :  { %v3646_v53 = vld [vmem:[#allocation5 + $0x520] sm:$0xf]  ;;  %v4602_v60 = vld [vmem:[#allocation5 + $0x72c] sm:$0xf0]  ;;  %v3519_v63 = vor.u32 %v4506_v52, %v3518_v49  ;;  %1808 = vmatpush.bf16.msrb.mxu2 %v3791_v51  ;;  %v4396_v35 = vld [vmem:[#allocation5 + $0xc4] sm:$0xf]  ;;  %v5015_v47 = vor.u32 %v4367_v31, %v2984_v32 }
  0x5a   :  { %v3774_v56 = vld [vmem:[#allocation5 + $0x620] sm:$0xf]  ;;  %v4502_v62 = vld [vmem:[#allocation5 + $0x40c] sm:$0xf0]  ;;  %v3647_v5 = vor.u32 %v4538_v54, %v3646_v53  ;;  %1822 = vmatpush.bf16.msrb.mxu3 %v3919_v55  ;;  %v3088_v36 = vld [vmem:[#allocation5 + $0xd0] sm:$0xf0] }
  0x5b   :  { %v3902_v59 = vld [vmem:[#allocation5 + $0x720] sm:$0xf]  ;;  %v4534_v2 = vld [vmem:[#allocation5 + $0x50c] sm:$0xf0]  ;;  %v3775_v6 = vor.u32 %v4570_v57, %v3774_v56  ;;  %1781 = vmatpush.bf16.msrb.mxu0 %v3519_v63  ;;  %v4428_v37 = vld [vmem:[#allocation5 + $0x1c4] sm:$0xf]  ;;  %v3091_v48 = vor.u32 %v4396_v35, %v3088_v36 }
  0x5c   :  { %v3502_v61 = vld [vmem:[#allocation5 + $0x400] sm:$0xf]  ;;  %v4566_v4 = vld [vmem:[#allocation5 + $0x60c] sm:$0xf0]  ;;  %v3903_v11 = vor.u32 %v4602_v60, %v3902_v59  ;;  %1795 = vmatpush.bf16.msrb.mxu1 %v3647_v5  ;;  %v3216_v40 = vld [vmem:[#allocation5 + $0x1d0] sm:$0xf0] }
  0x5d   :  { %v3630_v0 = vld [vmem:[#allocation5 + $0x500] sm:$0xf]  ;;  %v4598_v8 = vld [vmem:[#allocation5 + $0x70c] sm:$0xf0]  ;;  %v3503_v19 = vor.u32 %v4502_v62, %v3502_v61  ;;  %1809 = vmatpush.bf16.msrb.mxu2 %v3775_v6  ;;  %v4460_v41 = vld [vmem:[#allocation5 + $0x2c4] sm:$0xf]  ;;  %v3219_v49 = vor.u32 %v4428_v37, %v3216_v40 }
  0x5e   :  { %v3758_v3 = vld [vmem:[#allocation5 + $0x600] sm:$0xf]  ;;  %v2974_v21 = vld [vmem:[#allocation2 + $0x10] sm:$0xf]  ;;  %v3631_v23 = vor.u32 %v4534_v2, %v3630_v0  ;;  %1823 = vmatpush.bf16.msrb.mxu3 %v3903_v11  ;;  %v3344_v42 = vld [vmem:[#allocation5 + $0x2d0] sm:$0xf0] }
  0x5f   :  { %v3886_v7 = vld [vmem:[#allocation5 + $0x700] sm:$0xf]  ;;  %v4370_v22 = vld [vmem:[#allocation2 + $0x2c] sm:$0xf0]  ;;  %v3759_v24 = vor.u32 %v4566_v4, %v3758_v3  ;;  %1782 = vmatpush.bf16.msrb.mxu0 %v3503_v19  ;;  %v4492_v45 = vld [vmem:[#allocation5 + $0x3c4] sm:$0xf]  ;;  %v3347_v50 = vor.u32 %v4460_v41, %v3344_v42 }
  0x60   :  { %v3887_v28 = vor.u32 %v4598_v8, %v3886_v7  ;;  %v5009_v39 = vor.u32 %v4370_v22, %v2974_v21  ;;  %1796 = vmatpush.bf16.msrb.mxu1 %v3631_v23  ;;  %v3472_v46 = vld [vmem:[#allocation5 + $0x3d0] sm:$0xf0]  ;;  %v4392_v51 = vld [vmem:[#allocation5 + $0xa4] sm:$0xf] }
  0x61   :  { %1810 = vmatpush.bf16.msrb.mxu2 %v3759_v24  ;;  %v3072_v52 = vld [vmem:[#allocation5 + $0xb0] sm:$0xf0]  ;;  %v4424_v53 = vld [vmem:[#allocation5 + $0x1a4] sm:$0xf]  ;;  %v3475_v54 = vor.u32 %v4492_v45, %v3472_v46 }
  0x62   :  { %1824 = vmatpush.bf16.msrb.mxu3 %v3887_v28  ;;  %1783 = vmatmul.bf16.vlgmr.msrb.gmra.mxu0 %v5009_v39  ;;  %v3200_v55 = vld [vmem:[#allocation5 + $0x1b0] sm:$0xf0]  ;;  %v4456_v56 = vld [vmem:[#allocation5 + $0x2a4] sm:$0xf]  ;;  %v3075_v61 = vor.u32 %v4392_v51, %v3072_v52 }
  0x63   :  { %1831 = vmatpush.bf16.msra.mxu0 %v3107_v29  ;;  %v3328_v57 = vld [vmem:[#allocation5 + $0x2b0] sm:$0xf0]  ;;  %1797 = vmatmul.bf16.vlgmr.msrb.gmra.mxu1 %v5013_v44  ;;  %v4488_v59 = vld [vmem:[#allocation5 + $0x3a4] sm:$0xf]  ;;  %v3203_v62 = vor.u32 %v4424_v53, %v3200_v55 }
  0x64   :  { %1845 = vmatpush.bf16.msra.mxu1 %v3235_v33  ;;  %1811 = vmatmul.bf16.vlgmr.msrb.gmra.mxu2 %v5011_v43  ;;  %v3456_v60 = vld [vmem:[#allocation5 + $0x3b0] sm:$0xf0]  ;;  %v3331_v63 = vor.u32 %v4456_v56, %v3328_v57  ;;  %v4388_v0 = vld [vmem:[#allocation5 + $0x84] sm:$0xf] }
  0x65   :  { %1859 = vmatpush.bf16.msra.mxu2 %v3363_v34  ;;  %1825 = vmatmul.bf16.vlgmr.msrb.gmra.mxu3 %v5015_v47  ;;  %v3056_v2 = vld [vmem:[#allocation5 + $0x90] sm:$0xf0]  ;;  %v4420_v3 = vld [vmem:[#allocation5 + $0x184] sm:$0xf]  ;;  %v3459_v4 = vor.u32 %v4488_v59, %v3456_v60 }
  0x66   :  { %1873 = vmatpush.bf16.msra.mxu3 %v3491_v38  ;;  %v3184_v5 = vld [vmem:[#allocation5 + $0x190] sm:$0xf0]  ;;  %v4452_v6 = vld [vmem:[#allocation5 + $0x284] sm:$0xf]  ;;  %v3059_v11 = vor.u32 %v4388_v0, %v3056_v2 }
  0x67   :  { %1832 = vmatpush.bf16.msra.mxu0 %v3091_v48  ;;  %v3312_v7 = vld [vmem:[#allocation5 + $0x290] sm:$0xf0]  ;;  %v4484_v8 = vld [vmem:[#allocation5 + $0x384] sm:$0xf]  ;;  %v3187_v12 = vor.u32 %v4420_v3, %v3184_v5 }
  0x68   :  { %1846 = vmatpush.bf16.msra.mxu1 %v3219_v49  ;;  %v3440_v9 = vld [vmem:[#allocation5 + $0x390] sm:$0xf0]  ;;  %v3315_v13 = vor.u32 %v4452_v6, %v3312_v7  ;;  %v4384_v14 = vld [vmem:[#allocation5 + $0x64] sm:$0xf] }
  0x69   :  { %1860 = vmatpush.bf16.msra.mxu2 %v3347_v50  ;;  %v3040_v15 = vld [vmem:[#allocation5 + $0x70] sm:$0xf0]  ;;  %v4416_v16 = vld [vmem:[#allocation5 + $0x164] sm:$0xf]  ;;  %v3443_v18 = vor.u32 %v4484_v8, %v3440_v9 }
  0x6a   :  { %1874 = vmatpush.bf16.msra.mxu3 %v3475_v54  ;;  %v3168_v19 = vld [vmem:[#allocation5 + $0x170] sm:$0xf0]  ;;  %v4448_v20 = vld [vmem:[#allocation5 + $0x264] sm:$0xf]  ;;  %v3043_v24 = vor.u32 %v4384_v14, %v3040_v15 }
  0x6b   :  { %1833 = vmatpush.bf16.msra.mxu0 %v3075_v61  ;;  %v3296_v21 = vld [vmem:[#allocation5 + $0x270] sm:$0xf0]  ;;  %v4480_v22 = vld [vmem:[#allocation5 + $0x364] sm:$0xf]  ;;  %v3171_v25 = vor.u32 %v4416_v16, %v3168_v19 }
  0x6c   :  { %1847 = vmatpush.bf16.msra.mxu1 %v3203_v62  ;;  %v3424_v23 = vld [vmem:[#allocation5 + $0x370] sm:$0xf0]  ;;  %v3299_v26 = vor.u32 %v4448_v20, %v3296_v21  ;;  %v4380_v27 = vld [vmem:[#allocation5 + $0x44] sm:$0xf] }
  0x6d   :  { %1861 = vmatpush.bf16.msra.mxu2 %v3331_v63  ;;  %v3024_v28 = vld [vmem:[#allocation5 + $0x50] sm:$0xf0]  ;;  %v4412_v29 = vld [vmem:[#allocation5 + $0x144] sm:$0xf]  ;;  %v3427_v30 = vor.u32 %v4480_v22, %v3424_v23 }
  0x6e   :  { %1875 = vmatpush.bf16.msra.mxu3 %v3459_v4  ;;  %v3152_v31 = vld [vmem:[#allocation5 + $0x150] sm:$0xf0]  ;;  %v4444_v32 = vld [vmem:[#allocation5 + $0x244] sm:$0xf]  ;;  %v3027_v36 = vor.u32 %v4380_v27, %v3024_v28 }
  0x6f   :  { %1834 = vmatpush.bf16.msra.mxu0 %v3059_v11  ;;  %v3280_v33 = vld [vmem:[#allocation5 + $0x250] sm:$0xf0]  ;;  %v4476_v34 = vld [vmem:[#allocation5 + $0x344] sm:$0xf]  ;;  %v3155_v37 = vor.u32 %v4412_v29, %v3152_v31 }
  0x70   :  { %1848 = vmatpush.bf16.msra.mxu1 %v3187_v12  ;;  %v3408_v35 = vld [vmem:[#allocation5 + $0x350] sm:$0xf0]  ;;  %v3283_v38 = vor.u32 %v4444_v32, %v3280_v33  ;;  %v4376_v40 = vld [vmem:[#allocation5 + $0x24] sm:$0xf] }
  0x71   :  { %1862 = vmatpush.bf16.msra.mxu2 %v3315_v13  ;;  %v3008_v41 = vld [vmem:[#allocation5 + $0x30] sm:$0xf0]  ;;  %v4408_v42 = vld [vmem:[#allocation5 + $0x124] sm:$0xf]  ;;  %v3411_v45 = vor.u32 %v4476_v34, %v3408_v35 }
  0x72   :  { %1876 = vmatpush.bf16.msra.mxu3 %v3443_v18  ;;  %v3136_v46 = vld [vmem:[#allocation5 + $0x130] sm:$0xf0]  ;;  %v4440_v48 = vld [vmem:[#allocation5 + $0x224] sm:$0xf]  ;;  %v3011_v52 = vor.u32 %v4376_v40, %v3008_v41 }
  0x73   :  { %1835 = vmatpush.bf16.msra.mxu0 %v3043_v24  ;;  %v3264_v49 = vld [vmem:[#allocation5 + $0x230] sm:$0xf0]  ;;  %v4472_v50 = vld [vmem:[#allocation5 + $0x324] sm:$0xf]  ;;  %v3139_v55 = vor.u32 %v4408_v42, %v3136_v46 }
  0x74   :  { %1849 = vmatpush.bf16.msra.mxu1 %v3171_v25  ;;  %v3392_v51 = vld [vmem:[#allocation5 + $0x330] sm:$0xf0]  ;;  %v4372_v53 = vld [vmem:[#allocation5 + $0x4] sm:$0xf]  ;;  %v3267_v56 = vor.u32 %v4440_v48, %v3264_v49 }
  0x75   :  { %1863 = vmatpush.bf16.msra.mxu2 %v3299_v26  ;;  %v2992_v54 = vld [vmem:[#allocation5 + $0x10] sm:$0xf0]  ;;  %v4404_v57 = vld [vmem:[#allocation5 + $0x104] sm:$0xf]  ;;  %v3395_v61 = vor.u32 %v4472_v50, %v3392_v51 }
  0x76   :  { %1877 = vmatpush.bf16.msra.mxu3 %v3427_v30  ;;  %v3120_v59 = vld [vmem:[#allocation5 + $0x110] sm:$0xf0]  ;;  %v4436_v60 = vld [vmem:[#allocation5 + $0x204] sm:$0xf]  ;;  %v2995_v5 = vor.u32 %v4372_v53, %v2992_v54 }
  0x77   :  { %1836 = vmatpush.bf16.msra.mxu0 %v3027_v36  ;;  %v3248_v62 = vld [vmem:[#allocation5 + $0x210] sm:$0xf0]  ;;  %v4468_v63 = vld [vmem:[#allocation5 + $0x304] sm:$0xf]  ;;  %v3123_v9 = vor.u32 %v4404_v57, %v3120_v59 }
  0x78   :  { %1850 = vmatpush.bf16.msra.mxu1 %v3155_v37  ;;  %v3376_v0 = vld [vmem:[#allocation5 + $0x310] sm:$0xf0]  ;;  %v4528_v2 = vld [vmem:[#allocation5 + $0x4e4] sm:$0xf]  ;;  %v3251_v11 = vor.u32 %v4436_v60, %v3248_v62 }
  0x79   :  { %1864 = vmatpush.bf16.msra.mxu2 %v3283_v38  ;;  %v3616_v3 = vld [vmem:[#allocation5 + $0x4f0] sm:$0xf0]  ;;  %v4560_v4 = vld [vmem:[#allocation5 + $0x5e4] sm:$0xf]  ;;  %v3379_v14 = vor.u32 %v4468_v63, %v3376_v0 }
  0x7a   :  { %1878 = vmatpush.bf16.msra.mxu3 %v3411_v45  ;;  %v3744_v6 = vld [vmem:[#allocation5 + $0x5f0] sm:$0xf0]  ;;  %v4592_v7 = vld [vmem:[#allocation5 + $0x6e4] sm:$0xf]  ;;  %v3619_v15 = vor.u32 %v4528_v2, %v3616_v3 }
  0x7b   :  { %1837 = vmatpush.bf16.msra.mxu0 %v3011_v52  ;;  %v3872_v8 = vld [vmem:[#allocation5 + $0x6f0] sm:$0xf0]  ;;  %v4624_v12 = vld [vmem:[#allocation5 + $0x7e4] sm:$0xf]  ;;  %v3747_v16 = vor.u32 %v4560_v4, %v3744_v6 }
  0x7c   :  { %1851 = vmatpush.bf16.msra.mxu1 %v3139_v55  ;;  %v4000_v13 = vld [vmem:[#allocation5 + $0x7f0] sm:$0xf0]  ;;  %v3875_v18 = vor.u32 %v4592_v7, %v3872_v8  ;;  %v4524_v19 = vld [vmem:[#allocation5 + $0x4c4] sm:$0xf] }
  0x7d   :  { %1865 = vmatpush.bf16.msra.mxu2 %v3267_v56  ;;  %v3600_v20 = vld [vmem:[#allocation5 + $0x4d0] sm:$0xf0]  ;;  %v4556_v21 = vld [vmem:[#allocation5 + $0x5c4] sm:$0xf]  ;;  %v4003_v22 = vor.u32 %v4624_v12, %v4000_v13 }
  0x7e   :  { %1879 = vmatpush.bf16.msra.mxu3 %v3395_v61  ;;  %v3728_v23 = vld [vmem:[#allocation5 + $0x5d0] sm:$0xf0]  ;;  %v4588_v24 = vld [vmem:[#allocation5 + $0x6c4] sm:$0xf]  ;;  %v3603_v28 = vor.u32 %v4524_v19, %v3600_v20 }
  0x7f   :  { %1838 = vmatpush.bf16.msra.mxu0 %v2995_v5  ;;  %v3856_v25 = vld [vmem:[#allocation5 + $0x6d0] sm:$0xf0]  ;;  %v4620_v26 = vld [vmem:[#allocation5 + $0x7c4] sm:$0xf]  ;;  %v3731_v29 = vor.u32 %v4556_v21, %v3728_v23 }
  0x80   :  { %1852 = vmatpush.bf16.msra.mxu1 %v3123_v9  ;;  %v3984_v27 = vld [vmem:[#allocation5 + $0x7d0] sm:$0xf0]  ;;  %v3859_v30 = vor.u32 %v4588_v24, %v3856_v25  ;;  %v4520_v31 = vld [vmem:[#allocation5 + $0x4a4] sm:$0xf] }
  0x81   :  { %1866 = vmatpush.bf16.msra.mxu2 %v3251_v11  ;;  %v3584_v32 = vld [vmem:[#allocation5 + $0x4b0] sm:$0xf0]  ;;  %v4552_v33 = vld [vmem:[#allocation5 + $0x5a4] sm:$0xf]  ;;  %v3987_v34 = vor.u32 %v4620_v26, %v3984_v27 }
  0x82   :  { %1880 = vmatpush.bf16.msra.mxu3 %v3379_v14  ;;  %v3712_v35 = vld [vmem:[#allocation5 + $0x5b0] sm:$0xf0]  ;;  %v4584_v36 = vld [vmem:[#allocation5 + $0x6a4] sm:$0xf]  ;;  %1839 = vmatmul.bf16.vlgmr.msra.gmra.mxu0 %v4997_v58  ;;  %v3587_v41 = vor.u32 %v4520_v31, %v3584_v32 }
  0x83   :  { %1887 = vmatpush.bf16.msrb.mxu0 %v3619_v15  ;;  %v3840_v37 = vld [vmem:[#allocation5 + $0x6b0] sm:$0xf0]  ;;  %v4616_v38 = vld [vmem:[#allocation5 + $0x7a4] sm:$0xf]  ;;  %1853 = vmatmul.bf16.vlgmr.msra.gmra.mxu1 %v5003_v10  ;;  %v3715_v42 = vor.u32 %v4552_v33, %v3712_v35 }
  0x84   :  { %1901 = vmatpush.bf16.msrb.mxu1 %v3747_v16  ;;  %v3968_v40 = vld [vmem:[#allocation5 + $0x7b0] sm:$0xf0]  ;;  %1867 = vmatmul.bf16.vlgmr.msra.gmra.mxu2 %v4999_v1  ;;  %v3843_v45 = vor.u32 %v4584_v36, %v3840_v37  ;;  %v4516_v46 = vld [vmem:[#allocation5 + $0x484] sm:$0xf] }
  0x85   :  { %1915 = vmatpush.bf16.msrb.mxu2 %v3875_v18  ;;  %1881 = vmatmul.bf16.vlgmr.msra.gmra.mxu3 %v5005_v17  ;;  %v3568_v48 = vld [vmem:[#allocation5 + $0x490] sm:$0xf0]  ;;  %v4548_v49 = vld [vmem:[#allocation5 + $0x584] sm:$0xf]  ;;  %v3971_v50 = vor.u32 %v4616_v38, %v3968_v40 }
  0x86   :  { %1929 = vmatpush.bf16.msrb.mxu3 %v4003_v22  ;;  %v3696_v51 = vld [vmem:[#allocation5 + $0x590] sm:$0xf0]  ;;  %v4580_v52 = vld [vmem:[#allocation5 + $0x684] sm:$0xf]  ;;  %v3571_v56 = vor.u32 %v4516_v46, %v3568_v48  ;;  %v3110_v48 = vld [vmem:[#allocation5 + $0xe8] sm:$0xf] }
  0x87   :  { %1888 = vmatpush.bf16.msrb.mxu0 %v3603_v28  ;;  %v3824_v53 = vld [vmem:[#allocation5 + $0x690] sm:$0xf0]  ;;  %v4612_v54 = vld [vmem:[#allocation5 + $0x784] sm:$0xf]  ;;  %v3699_v57 = vor.u32 %v4548_v49, %v3696_v51  ;;  %v4403_v49 = vld [vmem:[#allocation5 + $0xf4] sm:$0xf0] }
  0x88   :  { %1902 = vmatpush.bf16.msrb.mxu1 %v3731_v29  ;;  %v3952_v55 = vld [vmem:[#allocation5 + $0x790] sm:$0xf0]  ;;  %v3827_v59 = vor.u32 %v4580_v52, %v3824_v53  ;;  %v4512_v60 = vld [vmem:[#allocation5 + $0x464] sm:$0xf]  ;;  %v4435_v52 = vld [vmem:[#allocation5 + $0x1f4] sm:$0xf0] }
  0x89   :  { %1916 = vmatpush.bf16.msrb.mxu2 %v3859_v30  ;;  %v3552_v61 = vld [vmem:[#allocation5 + $0x470] sm:$0xf0]  ;;  %v4544_v62 = vld [vmem:[#allocation5 + $0x564] sm:$0xf]  ;;  %v3955_v63 = vor.u32 %v4612_v54, %v3952_v55  ;;  %v3366_v53 = vld [vmem:[#allocation5 + $0x2e8] sm:$0xf] }
  0x8a   :  { %1930 = vmatpush.bf16.msrb.mxu3 %v3987_v34  ;;  %v3680_v0 = vld [vmem:[#allocation5 + $0x570] sm:$0xf0]  ;;  %v4576_v2 = vld [vmem:[#allocation5 + $0x664] sm:$0xf]  ;;  %v3555_v6 = vor.u32 %v4512_v60, %v3552_v61  ;;  %v4467_v54 = vld [vmem:[#allocation5 + $0x2f4] sm:$0xf0]  ;;  %v3111_v61 = vor.u32 %v4403_v49, %v3110_v48 }
  0x8b   :  { %1889 = vmatpush.bf16.msrb.mxu0 %v3587_v41  ;;  %v3808_v3 = vld [vmem:[#allocation5 + $0x670] sm:$0xf0]  ;;  %v4608_v4 = vld [vmem:[#allocation5 + $0x764] sm:$0xf]  ;;  %v3683_v7 = vor.u32 %v4544_v62, %v3680_v0  ;;  %v3094_v0 = vld [vmem:[#allocation5 + $0xc8] sm:$0xf] }
  0x8c   :  { %1903 = vmatpush.bf16.msrb.mxu1 %v3715_v42  ;;  %v3936_v5 = vld [vmem:[#allocation5 + $0x770] sm:$0xf0]  ;;  %v3811_v8 = vor.u32 %v4576_v2, %v3808_v3  ;;  %v4508_v9 = vld [vmem:[#allocation5 + $0x444] sm:$0xf]  ;;  %v4399_v2 = vld [vmem:[#allocation5 + $0xd4] sm:$0xf0] }
  0x8d   :  { %1917 = vmatpush.bf16.msrb.mxu2 %v3843_v45  ;;  %v3536_v11 = vld [vmem:[#allocation5 + $0x450] sm:$0xf0]  ;;  %v4540_v12 = vld [vmem:[#allocation5 + $0x544] sm:$0xf]  ;;  %v3939_v13 = vor.u32 %v4608_v4, %v3936_v5  ;;  %v3222_v3 = vld [vmem:[#allocation5 + $0x1c8] sm:$0xf] }
  0x8e   :  { %1931 = vmatpush.bf16.msrb.mxu3 %v3971_v50  ;;  %v3664_v14 = vld [vmem:[#allocation5 + $0x550] sm:$0xf0]  ;;  %v4572_v15 = vld [vmem:[#allocation5 + $0x644] sm:$0xf]  ;;  %v3539_v20 = vor.u32 %v4508_v9, %v3536_v11  ;;  %v3238_v50 = vld [vmem:[#allocation5 + $0x1e8] sm:$0xf]  ;;  %v3095_v11 = vor.u32 %v4399_v2, %v3094_v0 }
  0x8f   :  { %1890 = vmatpush.bf16.msrb.mxu0 %v3571_v56  ;;  %v3792_v16 = vld [vmem:[#allocation5 + $0x650] sm:$0xf0]  ;;  %v4604_v18 = vld [vmem:[#allocation5 + $0x744] sm:$0xf]  ;;  %v3667_v21 = vor.u32 %v4540_v12, %v3664_v14  ;;  %v3239_v62 = vor.u32 %v4435_v52, %v3238_v50  ;;  %v4431_v5 = vld [vmem:[#allocation5 + $0x1d4] sm:$0xf0] }
  0x90   :  { %1904 = vmatpush.bf16.msrb.mxu1 %v3699_v57  ;;  %v3920_v19 = vld [vmem:[#allocation5 + $0x750] sm:$0xf0]  ;;  %v3795_v22 = vor.u32 %v4572_v15, %v3792_v16  ;;  %v4504_v23 = vld [vmem:[#allocation5 + $0x424] sm:$0xf]  ;;  %v3494_v57 = vld [vmem:[#allocation5 + $0x3e8] sm:$0xf]  ;;  %v3223_v12 = vor.u32 %v4431_v5, %v3222_v3 }
  0x91   :  { %1918 = vmatpush.bf16.msrb.mxu2 %v3827_v59  ;;  %v3520_v24 = vld [vmem:[#allocation5 + $0x430] sm:$0xf0]  ;;  %v4536_v25 = vld [vmem:[#allocation5 + $0x524] sm:$0xf]  ;;  %v3923_v26 = vor.u32 %v4604_v18, %v3920_v19  ;;  %v4499_v59 = vld [vmem:[#allocation5 + $0x3f4] sm:$0xf0] }
  0x92   :  { %1932 = vmatpush.bf16.msrb.mxu3 %v3955_v63  ;;  %v3648_v27 = vld [vmem:[#allocation5 + $0x530] sm:$0xf0]  ;;  %v4568_v28 = vld [vmem:[#allocation5 + $0x624] sm:$0xf]  ;;  %v3523_v32 = vor.u32 %v4504_v23, %v3520_v24  ;;  %v3367_v63 = vor.u32 %v4467_v54, %v3366_v53  ;;  %v3495_v4 = vor.u32 %v4499_v59, %v3494_v57  ;;  %v4495_v9 = vld [vmem:[#allocation5 + $0x3d4] sm:$0xf0] }
  0x93   :  { %1891 = vmatpush.bf16.msrb.mxu0 %v3555_v6  ;;  %v3776_v29 = vld [vmem:[#allocation5 + $0x630] sm:$0xf0]  ;;  %v4600_v30 = vld [vmem:[#allocation5 + $0x724] sm:$0xf]  ;;  %v3651_v35 = vor.u32 %v4536_v25, %v3648_v27  ;;  %v3350_v6 = vld [vmem:[#allocation5 + $0x2c8] sm:$0xf] }
  0x94   :  { %1905 = vmatpush.bf16.msrb.mxu1 %v3683_v7  ;;  %v3904_v31 = vld [vmem:[#allocation5 + $0x730] sm:$0xf0]  ;;  %v4500_v33 = vld [vmem:[#allocation5 + $0x404] sm:$0xf]  ;;  %v3779_v36 = vor.u32 %v4568_v28, %v3776_v29  ;;  %v4463_v7 = vld [vmem:[#allocation5 + $0x2d4] sm:$0xf0] }
  0x95   :  { %1919 = vmatpush.bf16.msrb.mxu2 %v3811_v8  ;;  %v3504_v34 = vld [vmem:[#allocation5 + $0x410] sm:$0xf0]  ;;  %v4532_v37 = vld [vmem:[#allocation5 + $0x504] sm:$0xf]  ;;  %v3907_v41 = vor.u32 %v4600_v30, %v3904_v31  ;;  %v3478_v8 = vld [vmem:[#allocation5 + $0x3c8] sm:$0xf] }
  0x96   :  { %1933 = vmatpush.bf16.msrb.mxu3 %v3939_v13  ;;  %v3632_v38 = vld [vmem:[#allocation5 + $0x510] sm:$0xf0]  ;;  %v4564_v40 = vld [vmem:[#allocation5 + $0x604] sm:$0xf]  ;;  %v3507_v51 = vor.u32 %v4500_v33, %v3504_v34  ;;  %v3351_v13 = vor.u32 %v4463_v7, %v3350_v6  ;;  %v3078_v14 = vld [vmem:[#allocation5 + $0xa8] sm:$0xf]  ;;  %v3479_v18 = vor.u32 %v4495_v9, %v3478_v8 }
  0x97   :  { %1892 = vmatpush.bf16.msrb.mxu0 %v3539_v20  ;;  %v3760_v42 = vld [vmem:[#allocation5 + $0x610] sm:$0xf0]  ;;  %v4596_v45 = vld [vmem:[#allocation5 + $0x704] sm:$0xf]  ;;  %v3635_v55 = vor.u32 %v4532_v37, %v3632_v38  ;;  %v4395_v15 = vld [vmem:[#allocation5 + $0xb4] sm:$0xf0] }
  0x98   :  { %1906 = vmatpush.bf16.msrb.mxu1 %v3667_v21  ;;  %v3888_v46 = vld [vmem:[#allocation5 + $0x710] sm:$0xf0]  ;;  %v3763_v56 = vor.u32 %v4564_v40, %v3760_v42  ;;  %v3206_v16 = vld [vmem:[#allocation5 + $0x1a8] sm:$0xf]  ;;  %v4427_v19 = vld [vmem:[#allocation5 + $0x1b4] sm:$0xf0]  ;;  %v3079_v24 = vor.u32 %v4395_v15, %v3078_v14 }
  0x99   :  { %1920 = vmatpush.bf16.msrb.mxu2 %v3795_v22  ;;  %v3891_v60 = vor.u32 %v4596_v45, %v3888_v46  ;;  %v3334_v20 = vld [vmem:[#allocation5 + $0x2a8] sm:$0xf]  ;;  %v4459_v21 = vld [vmem:[#allocation5 + $0x2b4] sm:$0xf0]  ;;  %v3207_v25 = vor.u32 %v4427_v19, %v3206_v16 }
  0x9a   :  { %1934 = vmatpush.bf16.msrb.mxu3 %v3923_v26  ;;  %v3462_v22 = vld [vmem:[#allocation5 + $0x3a8] sm:$0xf]  ;;  %v4491_v23 = vld [vmem:[#allocation5 + $0x3b4] sm:$0xf0]  ;;  %v3335_v26 = vor.u32 %v4459_v21, %v3334_v20 }
  0x9b   :  { %1893 = vmatpush.bf16.msrb.mxu0 %v3523_v32  ;;  %v3062_v27 = vld [vmem:[#allocation5 + $0x88] sm:$0xf]  ;;  %v4391_v28 = vld [vmem:[#allocation5 + $0x94] sm:$0xf0]  ;;  %v3463_v30 = vor.u32 %v4491_v23, %v3462_v22 }
  0x9c   :  { %1907 = vmatpush.bf16.msrb.mxu1 %v3651_v35  ;;  %v3190_v29 = vld [vmem:[#allocation5 + $0x188] sm:$0xf]  ;;  %v4423_v31 = vld [vmem:[#allocation5 + $0x194] sm:$0xf0] }
  0x9d   :  { %1921 = vmatpush.bf16.msrb.mxu2 %v3779_v36  ;;  %v3318_v32 = vld [vmem:[#allocation5 + $0x288] sm:$0xf]  ;;  %v4455_v33 = vld [vmem:[#allocation5 + $0x294] sm:$0xf0]  ;;  %v3063_v36 = vor.u32 %v4391_v28, %v3062_v27  ;;  %v3191_v37 = vor.u32 %v4423_v31, %v3190_v29 }
  0x9e   :  { %1935 = vmatpush.bf16.msrb.mxu3 %v3907_v41  ;;  %v3446_v34 = vld [vmem:[#allocation5 + $0x388] sm:$0xf]  ;;  %v4487_v35 = vld [vmem:[#allocation5 + $0x394] sm:$0xf0]  ;;  %v3319_v38 = vor.u32 %v4455_v33, %v3318_v32 }
  0x9f   :  { %1894 = vmatpush.bf16.msrb.mxu0 %v3507_v51  ;;  %v3046_v40 = vld [vmem:[#allocation5 + $0x68] sm:$0xf]  ;;  %v4387_v41 = vld [vmem:[#allocation5 + $0x74] sm:$0xf0]  ;;  %v3447_v45 = vor.u32 %v4487_v35, %v3446_v34 }
  0xa0   :  { %1908 = vmatpush.bf16.msrb.mxu1 %v3635_v55  ;;  %v3174_v42 = vld [vmem:[#allocation5 + $0x168] sm:$0xf]  ;;  %v4419_v46 = vld [vmem:[#allocation5 + $0x174] sm:$0xf0]  ;;  %v3047_v52 = vor.u32 %v4387_v41, %v3046_v40 }
  0xa1   :  { %1922 = vmatpush.bf16.msrb.mxu2 %v3763_v56  ;;  %v3302_v48 = vld [vmem:[#allocation5 + $0x268] sm:$0xf]  ;;  %v4451_v49 = vld [vmem:[#allocation5 + $0x274] sm:$0xf0]  ;;  %v3175_v53 = vor.u32 %v4419_v46, %v3174_v42 }
  0xa2   :  { %1936 = vmatpush.bf16.msrb.mxu3 %v3891_v60  ;;  %1895 = vmatmul.bf16.vlgmr.msrb.gmra.mxu0 %v5009_v39  ;;  %v3430_v50 = vld [vmem:[#allocation5 + $0x368] sm:$0xf]  ;;  %v4483_v51 = vld [vmem:[#allocation5 + $0x374] sm:$0xf0]  ;;  %v3303_v54 = vor.u32 %v4451_v49, %v3302_v48 }
  0xa3   :  { %1943 = vmatpush.bf16.msra.mxu0 %v3111_v61  ;;  %1909 = vmatmul.bf16.vlgmr.msrb.gmra.mxu1 %v5013_v44  ;;  %v3030_v55 = vld [vmem:[#allocation5 + $0x48] sm:$0xf]  ;;  %v4383_v56 = vld [vmem:[#allocation5 + $0x54] sm:$0xf0]  ;;  %v3431_v59 = vor.u32 %v4483_v51, %v3430_v50 }
  0xa4   :  { %1957 = vmatpush.bf16.msra.mxu1 %v3239_v62  ;;  %1923 = vmatmul.bf16.vlgmr.msrb.gmra.mxu2 %v5011_v43  ;;  %v3158_v57 = vld [vmem:[#allocation5 + $0x148] sm:$0xf]  ;;  %v4415_v60 = vld [vmem:[#allocation5 + $0x154] sm:$0xf0]  ;;  %v3031_v2 = vor.u32 %v4383_v56, %v3030_v55 }
  0xa5   :  { %1971 = vmatpush.bf16.msra.mxu2 %v3367_v63  ;;  %1937 = vmatmul.bf16.vlgmr.msrb.gmra.mxu3 %v5015_v47  ;;  %v3286_v61 = vld [vmem:[#allocation5 + $0x248] sm:$0xf]  ;;  %v4447_v62 = vld [vmem:[#allocation5 + $0x254] sm:$0xf0]  ;;  %v3159_v3 = vor.u32 %v4415_v60, %v3158_v57 }
  0xa6   :  { %1985 = vmatpush.bf16.msra.mxu3 %v3495_v4  ;;  %v3414_v63 = vld [vmem:[#allocation5 + $0x348] sm:$0xf]  ;;  %v4479_v0 = vld [vmem:[#allocation5 + $0x354] sm:$0xf0]  ;;  %v3287_v4 = vor.u32 %v4447_v62, %v3286_v61 }
  0xa7   :  { %1944 = vmatpush.bf16.msra.mxu0 %v3095_v11  ;;  %v3014_v5 = vld [vmem:[#allocation5 + $0x28] sm:$0xf]  ;;  %v4379_v6 = vld [vmem:[#allocation5 + $0x34] sm:$0xf0]  ;;  %v3415_v8 = vor.u32 %v4479_v0, %v3414_v63 }
  0xa8   :  { %1958 = vmatpush.bf16.msra.mxu1 %v3223_v12  ;;  %v3142_v7 = vld [vmem:[#allocation5 + $0x128] sm:$0xf]  ;;  %v4411_v9 = vld [vmem:[#allocation5 + $0x134] sm:$0xf0]  ;;  %v3015_v15 = vor.u32 %v4379_v6, %v3014_v5 }
  0xa9   :  { %1972 = vmatpush.bf16.msra.mxu2 %v3351_v13  ;;  %v3270_v11 = vld [vmem:[#allocation5 + $0x228] sm:$0xf]  ;;  %v4443_v12 = vld [vmem:[#allocation5 + $0x234] sm:$0xf0]  ;;  %v3143_v19 = vor.u32 %v4411_v9, %v3142_v7 }
  0xaa   :  { %1986 = vmatpush.bf16.msra.mxu3 %v3479_v18  ;;  %v3398_v13 = vld [vmem:[#allocation5 + $0x328] sm:$0xf]  ;;  %v4475_v14 = vld [vmem:[#allocation5 + $0x334] sm:$0xf0]  ;;  %v3271_v20 = vor.u32 %v4443_v12, %v3270_v11 }
  0xab   :  { %1945 = vmatpush.bf16.msra.mxu0 %v3079_v24  ;;  %v2998_v16 = vld [vmem:[#allocation5 + $0x8] sm:$0xf]  ;;  %v4375_v18 = vld [vmem:[#allocation5 + $0x14] sm:$0xf0]  ;;  %v3399_v24 = vor.u32 %v4475_v14, %v3398_v13 }
  0xac   :  { %1959 = vmatpush.bf16.msra.mxu1 %v3207_v25  ;;  %v3126_v21 = vld [vmem:[#allocation5 + $0x108] sm:$0xf]  ;;  %v4407_v22 = vld [vmem:[#allocation5 + $0x114] sm:$0xf0]  ;;  %v2999_v31 = vor.u32 %v4375_v18, %v2998_v16 }
  0xad   :  { %1973 = vmatpush.bf16.msra.mxu2 %v3335_v26  ;;  %v3254_v23 = vld [vmem:[#allocation5 + $0x208] sm:$0xf]  ;;  %v4439_v25 = vld [vmem:[#allocation5 + $0x214] sm:$0xf0]  ;;  %v3127_v35 = vor.u32 %v4407_v22, %v3126_v21 }
  0xae   :  { %1987 = vmatpush.bf16.msra.mxu3 %v3463_v30  ;;  %v3382_v26 = vld [vmem:[#allocation5 + $0x308] sm:$0xf]  ;;  %v4471_v27 = vld [vmem:[#allocation5 + $0x314] sm:$0xf0] }
  0xaf   :  { %1946 = vmatpush.bf16.msra.mxu0 %v3063_v36  ;;  %v3622_v28 = vld [vmem:[#allocation5 + $0x4e8] sm:$0xf]  ;;  %v4531_v29 = vld [vmem:[#allocation5 + $0x4f4] sm:$0xf0]  ;;  %v3255_v36 = vor.u32 %v4439_v25, %v3254_v23  ;;  %v3383_v40 = vor.u32 %v4471_v27, %v3382_v26 }
  0xb0   :  { %1960 = vmatpush.bf16.msra.mxu1 %v3191_v37  ;;  %v3750_v30 = vld [vmem:[#allocation5 + $0x5e8] sm:$0xf]  ;;  %v4563_v32 = vld [vmem:[#allocation5 + $0x5f4] sm:$0xf0]  ;;  %v3623_v41 = vor.u32 %v4531_v29, %v3622_v28 }
  0xb1   :  { %1974 = vmatpush.bf16.msra.mxu2 %v3319_v38  ;;  %v3878_v33 = vld [vmem:[#allocation5 + $0x6e8] sm:$0xf]  ;;  %v4595_v34 = vld [vmem:[#allocation5 + $0x6f4] sm:$0xf0]  ;;  %v3751_v42 = vor.u32 %v4563_v32, %v3750_v30 }
  0xb2   :  { %1988 = vmatpush.bf16.msra.mxu3 %v3447_v45  ;;  %v4006_v37 = vld [vmem:[#allocation5 + $0x7e8] sm:$0xf]  ;;  %v4627_v38 = vld [vmem:[#allocation5 + $0x7f4] sm:$0xf0]  ;;  %v3879_v45 = vor.u32 %v4595_v34, %v3878_v33 }
  0xb3   :  { %1947 = vmatpush.bf16.msra.mxu0 %v3047_v52  ;;  %v3606_v46 = vld [vmem:[#allocation5 + $0x4c8] sm:$0xf]  ;;  %v4527_v48 = vld [vmem:[#allocation5 + $0x4d4] sm:$0xf0]  ;;  %v4007_v50 = vor.u32 %v4627_v38, %v4006_v37 }
  0xb4   :  { %1961 = vmatpush.bf16.msra.mxu1 %v3175_v53  ;;  %v3734_v49 = vld [vmem:[#allocation5 + $0x5c8] sm:$0xf]  ;;  %v4559_v51 = vld [vmem:[#allocation5 + $0x5d4] sm:$0xf0]  ;;  %v3607_v56 = vor.u32 %v4527_v48, %v3606_v46 }
  0xb5   :  { %1975 = vmatpush.bf16.msra.mxu2 %v3303_v54  ;;  %v3862_v52 = vld [vmem:[#allocation5 + $0x6c8] sm:$0xf]  ;;  %v4591_v53 = vld [vmem:[#allocation5 + $0x6d4] sm:$0xf0]  ;;  %v3735_v57 = vor.u32 %v4559_v51, %v3734_v49 }
  0xb6   :  { %1989 = vmatpush.bf16.msra.mxu3 %v3431_v59  ;;  %v3990_v54 = vld [vmem:[#allocation5 + $0x7c8] sm:$0xf]  ;;  %v4623_v55 = vld [vmem:[#allocation5 + $0x7d4] sm:$0xf0]  ;;  %v3863_v59 = vor.u32 %v4591_v53, %v3862_v52 }
  0xb7   :  { %1948 = vmatpush.bf16.msra.mxu0 %v3031_v2  ;;  %v3590_v60 = vld [vmem:[#allocation5 + $0x4a8] sm:$0xf]  ;;  %v4523_v61 = vld [vmem:[#allocation5 + $0x4b4] sm:$0xf0]  ;;  %v3991_v63 = vor.u32 %v4623_v55, %v3990_v54 }
  0xb8   :  { %1962 = vmatpush.bf16.msra.mxu1 %v3159_v3  ;;  %v3718_v62 = vld [vmem:[#allocation5 + $0x5a8] sm:$0xf]  ;;  %v4555_v0 = vld [vmem:[#allocation5 + $0x5b4] sm:$0xf0]  ;;  %v3591_v6 = vor.u32 %v4523_v61, %v3590_v60 }
  0xb9   :  { %1976 = vmatpush.bf16.msra.mxu2 %v3287_v4  ;;  %v3846_v2 = vld [vmem:[#allocation5 + $0x6a8] sm:$0xf]  ;;  %v4587_v3 = vld [vmem:[#allocation5 + $0x6b4] sm:$0xf0]  ;;  %v3719_v7 = vor.u32 %v4555_v0, %v3718_v62 }
  0xba   :  { %1990 = vmatpush.bf16.msra.mxu3 %v3415_v8  ;;  %v3974_v4 = vld [vmem:[#allocation5 + $0x7a8] sm:$0xf]  ;;  %v4619_v5 = vld [vmem:[#allocation5 + $0x7b4] sm:$0xf0]  ;;  %v3847_v8 = vor.u32 %v4587_v3, %v3846_v2 }
  0xbb   :  { %1949 = vmatpush.bf16.msra.mxu0 %v3015_v15  ;;  %v3574_v9 = vld [vmem:[#allocation5 + $0x488] sm:$0xf]  ;;  %v4519_v11 = vld [vmem:[#allocation5 + $0x494] sm:$0xf0]  ;;  %v3975_v13 = vor.u32 %v4619_v5, %v3974_v4 }
  0xbc   :  { %1963 = vmatpush.bf16.msra.mxu1 %v3143_v19  ;;  %v3702_v12 = vld [vmem:[#allocation5 + $0x588] sm:$0xf]  ;;  %v4551_v14 = vld [vmem:[#allocation5 + $0x594] sm:$0xf0] }
  0xbd   :  { %1977 = vmatpush.bf16.msra.mxu2 %v3271_v20  ;;  %v3830_v15 = vld [vmem:[#allocation5 + $0x688] sm:$0xf]  ;;  %v4583_v16 = vld [vmem:[#allocation5 + $0x694] sm:$0xf0]  ;;  %v3575_v20 = vor.u32 %v4519_v11, %v3574_v9  ;;  %v3703_v21 = vor.u32 %v4551_v14, %v3702_v12  ;;  %v4401_v11 = vld [vmem:[#allocation5 + $0xec] sm:$0xf] }
  0xbe   :  { %1991 = vmatpush.bf16.msra.mxu3 %v3399_v24  ;;  %v3958_v18 = vld [vmem:[#allocation5 + $0x788] sm:$0xf]  ;;  %v4615_v19 = vld [vmem:[#allocation5 + $0x794] sm:$0xf0]  ;;  %v3831_v22 = vor.u32 %v4583_v16, %v3830_v15  ;;  %v3112_v12 = vld [vmem:[#allocation5 + $0xf8] sm:$0xf0] }
  0xbf   :  { %1950 = vmatpush.bf16.msra.mxu0 %v2999_v31  ;;  %v3558_v23 = vld [vmem:[#allocation5 + $0x468] sm:$0xf]  ;;  %v4515_v24 = vld [vmem:[#allocation5 + $0x474] sm:$0xf0]  ;;  %v3959_v26 = vor.u32 %v4615_v19, %v3958_v18  ;;  %v3240_v15 = vld [vmem:[#allocation5 + $0x1f8] sm:$0xf0] }
  0xc0   :  { %1964 = vmatpush.bf16.msra.mxu1 %v3127_v35  ;;  %v3686_v25 = vld [vmem:[#allocation5 + $0x568] sm:$0xf]  ;;  %v4547_v27 = vld [vmem:[#allocation5 + $0x574] sm:$0xf0]  ;;  %v3559_v32 = vor.u32 %v4515_v24, %v3558_v23  ;;  %v4465_v16 = vld [vmem:[#allocation5 + $0x2ec] sm:$0xf]  ;;  %v3115_v24 = vor.u32 %v4401_v11, %v3112_v12 }
  0xc1   :  { %1978 = vmatpush.bf16.msra.mxu2 %v3255_v36  ;;  %v3814_v28 = vld [vmem:[#allocation5 + $0x668] sm:$0xf]  ;;  %v4579_v29 = vld [vmem:[#allocation5 + $0x674] sm:$0xf0]  ;;  %v3687_v33 = vor.u32 %v4547_v27, %v3686_v25  ;;  %v3368_v18 = vld [vmem:[#allocation5 + $0x2f8] sm:$0xf0] }
  0xc2   :  { %1992 = vmatpush.bf16.msra.mxu3 %v3383_v40  ;;  %1951 = vmatmul.bf16.vlgmr.msra.gmra.mxu0 %v4997_v58  ;;  %v3942_v30 = vld [vmem:[#allocation5 + $0x768] sm:$0xf]  ;;  %v4611_v31 = vld [vmem:[#allocation5 + $0x774] sm:$0xf0]  ;;  %v3815_v34 = vor.u32 %v4579_v29, %v3814_v28  ;;  %v4397_v27 = vld [vmem:[#allocation5 + $0xcc] sm:$0xf] }
  0xc3   :  { %1999 = vmatpush.bf16.msrb.mxu0 %v3623_v41  ;;  %1965 = vmatmul.bf16.vlgmr.msra.gmra.mxu1 %v5003_v10  ;;  %v3542_v35 = vld [vmem:[#allocation5 + $0x448] sm:$0xf]  ;;  %v4511_v36 = vld [vmem:[#allocation5 + $0x454] sm:$0xf0]  ;;  %v3943_v38 = vor.u32 %v4611_v31, %v3942_v30  ;;  %v3096_v28 = vld [vmem:[#allocation5 + $0xd8] sm:$0xf0] }
  0xc4   :  { %2013 = vmatpush.bf16.msrb.mxu1 %v3751_v42  ;;  %1979 = vmatmul.bf16.vlgmr.msra.gmra.mxu2 %v4999_v1  ;;  %v3670_v37 = vld [vmem:[#allocation5 + $0x548] sm:$0xf]  ;;  %v4543_v40 = vld [vmem:[#allocation5 + $0x554] sm:$0xf0]  ;;  %v3543_v48 = vor.u32 %v4511_v36, %v3542_v35  ;;  %v4429_v29 = vld [vmem:[#allocation5 + $0x1cc] sm:$0xf]  ;;  %v3099_v36 = vor.u32 %v4397_v27, %v3096_v28 }
  0xc5   :  { %2027 = vmatpush.bf16.msrb.mxu2 %v3879_v45  ;;  %1993 = vmatmul.bf16.vlgmr.msra.gmra.mxu3 %v5005_v17  ;;  %v3798_v41 = vld [vmem:[#allocation5 + $0x648] sm:$0xf]  ;;  %v4575_v42 = vld [vmem:[#allocation5 + $0x654] sm:$0xf0]  ;;  %v3671_v49 = vor.u32 %v4543_v40, %v3670_v37  ;;  %v3224_v31 = vld [vmem:[#allocation5 + $0x1d8] sm:$0xf0] }
  0xc6   :  { %2041 = vmatpush.bf16.msrb.mxu3 %v4007_v50  ;;  %v3926_v45 = vld [vmem:[#allocation5 + $0x748] sm:$0xf]  ;;  %v4607_v46 = vld [vmem:[#allocation5 + $0x754] sm:$0xf0]  ;;  %v3799_v50 = vor.u32 %v4575_v42, %v3798_v41  ;;  %v3480_v35 = vld [vmem:[#allocation5 + $0x3d8] sm:$0xf0]  ;;  %v3227_v37 = vor.u32 %v4429_v29, %v3224_v31 }
  0xc7   :  { %2000 = vmatpush.bf16.msrb.mxu0 %v3607_v56  ;;  %v3526_v51 = vld [vmem:[#allocation5 + $0x428] sm:$0xf]  ;;  %v4507_v52 = vld [vmem:[#allocation5 + $0x434] sm:$0xf0]  ;;  %v3927_v54 = vor.u32 %v4607_v46, %v3926_v45  ;;  %v4393_v40 = vld [vmem:[#allocation5 + $0xac] sm:$0xf] }
  0xc8   :  { %2014 = vmatpush.bf16.msrb.mxu1 %v3735_v57  ;;  %v3654_v53 = vld [vmem:[#allocation5 + $0x528] sm:$0xf]  ;;  %v4539_v55 = vld [vmem:[#allocation5 + $0x534] sm:$0xf0]  ;;  %v3527_v61 = vor.u32 %v4507_v52, %v3526_v51  ;;  %v3080_v41 = vld [vmem:[#allocation5 + $0xb8] sm:$0xf0] }
  0xc9   :  { %2028 = vmatpush.bf16.msrb.mxu2 %v3863_v59  ;;  %v3782_v56 = vld [vmem:[#allocation5 + $0x628] sm:$0xf]  ;;  %v4571_v57 = vld [vmem:[#allocation5 + $0x634] sm:$0xf0]  ;;  %v3655_v0 = vor.u32 %v4539_v55, %v3654_v53  ;;  %v4425_v42 = vld [vmem:[#allocation5 + $0x1ac] sm:$0xf]  ;;  %v3083_v52 = vor.u32 %v4393_v40, %v3080_v41 }
  0xca   :  { %2042 = vmatpush.bf16.msrb.mxu3 %v3991_v63  ;;  %v3910_v59 = vld [vmem:[#allocation5 + $0x728] sm:$0xf]  ;;  %v4603_v60 = vld [vmem:[#allocation5 + $0x734] sm:$0xf0]  ;;  %v3783_v2 = vor.u32 %v4571_v57, %v3782_v56  ;;  %v3208_v46 = vld [vmem:[#allocation5 + $0x1b8] sm:$0xf0] }
  0xcb   :  { %2001 = vmatpush.bf16.msrb.mxu0 %v3591_v6  ;;  %v3510_v62 = vld [vmem:[#allocation5 + $0x408] sm:$0xf]  ;;  %v4503_v63 = vld [vmem:[#allocation5 + $0x414] sm:$0xf0]  ;;  %v3911_v6 = vor.u32 %v4603_v60, %v3910_v59  ;;  %v3464_v51 = vld [vmem:[#allocation5 + $0x3b8] sm:$0xf0]  ;;  %v3211_v53 = vor.u32 %v4425_v42, %v3208_v46 }
  0xcc   :  { %2015 = vmatpush.bf16.msrb.mxu1 %v3719_v7  ;;  %v3638_v3 = vld [vmem:[#allocation5 + $0x508] sm:$0xf]  ;;  %v4535_v4 = vld [vmem:[#allocation5 + $0x514] sm:$0xf0]  ;;  %v3511_v14 = vor.u32 %v4503_v63, %v3510_v62  ;;  %v4389_v55 = vld [vmem:[#allocation5 + $0x8c] sm:$0xf] }
  0xcd   :  { %2029 = vmatpush.bf16.msrb.mxu2 %v3847_v8  ;;  %v3766_v5 = vld [vmem:[#allocation5 + $0x608] sm:$0xf]  ;;  %v4567_v7 = vld [vmem:[#allocation5 + $0x614] sm:$0xf0]  ;;  %v3639_v19 = vor.u32 %v4535_v4, %v3638_v3  ;;  %v3064_v56 = vld [vmem:[#allocation5 + $0x98] sm:$0xf0]  ;;  %v5037_v3 = vpop.f32.mrf.mxu0 }
  0xce   :  { %2043 = vmatpush.bf16.msrb.mxu3 %v3975_v13  ;;  %v3894_v8 = vld [vmem:[#allocation5 + $0x708] sm:$0xf]  ;;  %v4599_v9 = vld [vmem:[#allocation5 + $0x714] sm:$0xf0]  ;;  %v4433_v13 = vld [vmem:[#allocation5 + $0x1ec] sm:$0xf] }
  0xcf   :  { %2002 = vmatpush.bf16.msrb.mxu0 %v3575_v20  ;;  %v3767_v20 = vor.u32 %v4567_v7, %v3766_v5  ;;  %v3895_v23 = vor.u32 %v4599_v9, %v3894_v8  ;;  %v3243_v25 = vor.u32 %v4433_v13, %v3240_v15  ;;  %v4421_v57 = vld [vmem:[#allocation5 + $0x18c] sm:$0xf]  ;;  %v3192_v60 = vld [vmem:[#allocation5 + $0x198] sm:$0xf0]  ;;  %v5039_v9 = vpop.f32.mrf.mxu1 }
  0xd0   :  { %2016 = vmatpush.bf16.msrb.mxu1 %v3703_v21  ;;  %v4497_v21 = vld [vmem:[#allocation5 + $0x3ec] sm:$0xf]  ;;  %v3320_v62 = vld [vmem:[#allocation5 + $0x298] sm:$0xf0]  ;;  %v3195_v4 = vor.u32 %v4421_v57, %v3192_v60 }
  0xd1   :  { %2030 = vmatpush.bf16.msrb.mxu2 %v3831_v22  ;;  %v3496_v22 = vld [vmem:[#allocation5 + $0x3f8] sm:$0xf0]  ;;  %v4485_v63 = vld [vmem:[#allocation5 + $0x38c] sm:$0xf] }
  0xd2   :  { %2044 = vmatpush.bf16.msrb.mxu3 %v3959_v26  ;;  %v3371_v26 = vor.u32 %v4465_v16, %v3368_v18  ;;  %v3499_v30 = vor.u32 %v4497_v21, %v3496_v22  ;;  %v3048_v7 = vld [vmem:[#allocation5 + $0x78] sm:$0xf0]  ;;  %v4417_v8 = vld [vmem:[#allocation5 + $0x16c] sm:$0xf] }
  0xd3   :  { %2003 = vmatpush.bf16.msrb.mxu0 %v3559_v32  ;;  %v4461_v32 = vld [vmem:[#allocation5 + $0x2cc] sm:$0xf]  ;;  %v3176_v12 = vld [vmem:[#allocation5 + $0x178] sm:$0xf0] }
  0xd4   :  { %2017 = vmatpush.bf16.msrb.mxu1 %v3687_v33  ;;  %v3352_v33 = vld [vmem:[#allocation5 + $0x2d8] sm:$0xf0]  ;;  %v4449_v13 = vld [vmem:[#allocation5 + $0x26c] sm:$0xf] }
  0xd5   :  { %2031 = vmatpush.bf16.msrb.mxu2 %v3815_v34  ;;  %v4493_v34 = vld [vmem:[#allocation5 + $0x3cc] sm:$0xf]  ;;  %v3432_v16 = vld [vmem:[#allocation5 + $0x378] sm:$0xf0] }
  0xd6   :  { %2045 = vmatpush.bf16.msrb.mxu3 %v3943_v38  ;;  %v3355_v38 = vor.u32 %v4461_v32, %v3352_v33  ;;  %v3483_v45 = vor.u32 %v4493_v34, %v3480_v35  ;;  %v4481_v15 = vld [vmem:[#allocation5 + $0x36c] sm:$0xf]  ;;  %v3032_v22 = vld [vmem:[#allocation5 + $0x58] sm:$0xf0]  ;;  %v5043_v32 = vpop.f32.mrf.mxu3 }
  0xd7   :  { %2004 = vmatpush.bf16.msrb.mxu0 %v3543_v48  ;;  %v4457_v48 = vld [vmem:[#allocation5 + $0x2ac] sm:$0xf]  ;;  %v3288_v27 = vld [vmem:[#allocation5 + $0x258] sm:$0xf0] }
  0xd8   :  { %2018 = vmatpush.bf16.msrb.mxu1 %v3671_v49  ;;  %v3336_v49 = vld [vmem:[#allocation5 + $0x2b8] sm:$0xf0]  ;;  %v4381_v21 = vld [vmem:[#allocation5 + $0x4c] sm:$0xf] }
  0xd9   :  { %2032 = vmatpush.bf16.msrb.mxu2 %v3799_v50  ;;  %v4489_v50 = vld [vmem:[#allocation5 + $0x3ac] sm:$0xf]  ;;  %v3416_v29 = vld [vmem:[#allocation5 + $0x358] sm:$0xf0]  ;;  %v3035_v31 = vor.u32 %v4381_v21, %v3032_v22 }
  0xda   :  { %2046 = vmatpush.bf16.msrb.mxu3 %v3927_v54  ;;  %v3339_v54 = vor.u32 %v4457_v48, %v3336_v49  ;;  %v3467_v59 = vor.u32 %v4489_v50, %v3464_v51  ;;  %v4477_v28 = vld [vmem:[#allocation5 + $0x34c] sm:$0xf]  ;;  %v3144_v40 = vld [vmem:[#allocation5 + $0x138] sm:$0xf0]  ;;  %v5047_v49 = vpop.f32.mrf.mxu1 }
  0xdb   :  { %2005 = vmatpush.bf16.msrb.mxu0 %v3527_v61  ;;  %v4453_v61 = vld [vmem:[#allocation5 + $0x28c] sm:$0xf]  ;;  %v3272_v42 = vld [vmem:[#allocation5 + $0x238] sm:$0xf0] }
  0xdc   :  { %2019 = vmatpush.bf16.msrb.mxu1 %v3655_v0  ;;  %v3448_v0 = vld [vmem:[#allocation5 + $0x398] sm:$0xf0]  ;;  %v3323_v5 = vor.u32 %v4453_v61, %v3320_v62  ;;  %v4377_v35 = vld [vmem:[#allocation5 + $0x2c] sm:$0xf] }
  0xdd   :  { %2033 = vmatpush.bf16.msrb.mxu2 %v3783_v2  ;;  %v3067_v2 = vor.u32 %v4389_v55, %v3064_v56  ;;  %v3451_v11 = vor.u32 %v4485_v63, %v3448_v0  ;;  %v4441_v41 = vld [vmem:[#allocation5 + $0x22c] sm:$0xf]  ;;  %v3400_v48 = vld [vmem:[#allocation5 + $0x338] sm:$0xf0] }
  0xde   :  { %2047 = vmatpush.bf16.msrb.mxu3 %v3911_v6  ;;  %v4385_v6 = vld [vmem:[#allocation5 + $0x6c] sm:$0xf]  ;;  %v3128_v56 = vld [vmem:[#allocation5 + $0x118] sm:$0xf0] }
  0xdf   :  { %2006 = vmatpush.bf16.msrb.mxu0 %v3511_v14  ;;  %v3304_v14 = vld [vmem:[#allocation5 + $0x278] sm:$0xf0]  ;;  %v3051_v18 = vor.u32 %v4385_v6, %v3048_v7  ;;  %v4473_v46 = vld [vmem:[#allocation5 + $0x32c] sm:$0xf] }
  0xe0   :  { %2020 = vmatpush.bf16.msrb.mxu1 %v3639_v19  ;;  %v3179_v19 = vor.u32 %v4417_v8, %v3176_v12  ;;  %v4373_v51 = vld [vmem:[#allocation5 + $0xc] sm:$0xf]  ;;  %v3256_v60 = vld [vmem:[#allocation5 + $0x218] sm:$0xf0] }
  0xe1   :  { %2034 = vmatpush.bf16.msrb.mxu2 %v3767_v20  ;;  %v3307_v20 = vor.u32 %v4449_v13, %v3304_v14  ;;  %v4405_v55 = vld [vmem:[#allocation5 + $0x10c] sm:$0xf]  ;;  %v3384_v62 = vld [vmem:[#allocation5 + $0x318] sm:$0xf0] }
  0xe2   :  { %2048 = vmatpush.bf16.msrb.mxu3 %v3895_v23  ;;  %2007 = vmatmul.bf16.vlgmr.msrb.gmra.mxu0 %v5009_v39  ;;  %v4413_v23 = vld [vmem:[#allocation5 + $0x14c] sm:$0xf]  ;;  %v3624_v0 = vld [vmem:[#allocation5 + $0x4f8] sm:$0xf0]  ;;  %v3131_v8 = vor.u32 %v4405_v55, %v3128_v56 }
  0xe3   :  { %2055 = vmatpush.bf16.msra.mxu0 %v3115_v24  ;;  %2021 = vmatmul.bf16.vlgmr.msrb.gmra.mxu1 %v5013_v44  ;;  %v3435_v24 = vor.u32 %v4481_v15, %v3432_v16  ;;  %v4437_v57 = vld [vmem:[#allocation5 + $0x20c] sm:$0xf]  ;;  %v3880_v7 = vld [vmem:[#allocation5 + $0x6f8] sm:$0xf0] }
  0xe4   :  { %2069 = vmatpush.bf16.msra.mxu1 %v3243_v25  ;;  %2035 = vmatmul.bf16.vlgmr.msrb.gmra.mxu2 %v5011_v43  ;;  %v3160_v25 = vld [vmem:[#allocation5 + $0x158] sm:$0xf0]  ;;  %v4469_v61 = vld [vmem:[#allocation5 + $0x30c] sm:$0xf] }
  0xe5   :  { %2083 = vmatpush.bf16.msra.mxu2 %v3371_v26  ;;  %2049 = vmatmul.bf16.vlgmr.msrb.gmra.mxu3 %v5015_v47  ;;  %v4445_v26 = vld [vmem:[#allocation5 + $0x24c] sm:$0xf]  ;;  %v3163_v33 = vor.u32 %v4413_v23, %v3160_v25  ;;  %v4008_v13 = vld [vmem:[#allocation5 + $0x7f8] sm:$0xf0]  ;;  %v3387_v15 = vor.u32 %v4469_v61, %v3384_v62 }
  0xe6   :  { %2097 = vmatpush.bf16.msra.mxu3 %v3499_v30  ;;  %v5041_v30 = vpop.f32.mrf.mxu2  ;;  %v3291_v34 = vor.u32 %v4445_v26, %v3288_v27  ;;  %v4529_v63 = vld [vmem:[#allocation5 + $0x4ec] sm:$0xf]  ;;  %v3608_v22 = vld [vmem:[#allocation5 + $0x4d8] sm:$0xf0] }
  0xe7   :  { %2056 = vmatpush.bf16.msra.mxu0 %v3099_v36  ;;  %v3016_v36 = vld [vmem:[#allocation5 + $0x38] sm:$0xf0]  ;;  %v4593_v6 = vld [vmem:[#allocation5 + $0x6ec] sm:$0xf]  ;;  %v3627_v16 = vor.u32 %v4529_v63, %v3624_v0 }
  0xe8   :  { %2070 = vmatpush.bf16.msra.mxu1 %v3227_v37  ;;  %v4409_v37 = vld [vmem:[#allocation5 + $0x12c] sm:$0xf]  ;;  %v3019_v50 = vor.u32 %v4377_v35, %v3016_v36  ;;  %v3736_v25 = vld [vmem:[#allocation5 + $0x5d8] sm:$0xf0] }
  0xe9   :  { %2084 = vmatpush.bf16.msra.mxu2 %v3355_v38  ;;  %v3419_v38 = vor.u32 %v4477_v28, %v3416_v29  ;;  %v4625_v12 = vld [vmem:[#allocation5 + $0x7ec] sm:$0xf]  ;;  %v3864_v27 = vld [vmem:[#allocation5 + $0x6d8] sm:$0xf0] }
  0xea   :  { %2098 = vmatpush.bf16.msra.mxu3 %v3483_v45  ;;  %v5045_v45 = vpop.f32.mrf.mxu0  ;;  %v4525_v21 = vld [vmem:[#allocation5 + $0x4cc] sm:$0xf]  ;;  %v3576_v56 = vld [vmem:[#allocation5 + $0x498] sm:$0xf0] }
  0xeb   :  { %2057 = vmatpush.bf16.msra.mxu0 %v3083_v52  ;;  %v3000_v52 = vld [vmem:[#allocation5 + $0x18] sm:$0xf0]  ;;  %v4557_v23 = vld [vmem:[#allocation5 + $0x5cc] sm:$0xf] }
  0xec   :  { %2071 = vmatpush.bf16.msra.mxu1 %v3211_v53  ;;  %v3147_v53 = vor.u32 %v4409_v37, %v3144_v40  ;;  %v4589_v26 = vld [vmem:[#allocation5 + $0x6cc] sm:$0xf]  ;;  %v3739_v35 = vor.u32 %v4557_v23, %v3736_v25  ;;  %v3960_v63 = vld [vmem:[#allocation5 + $0x798] sm:$0xf0] }
  0xed   :  { %2085 = vmatpush.bf16.msra.mxu2 %v3339_v54  ;;  %v3275_v54 = vor.u32 %v4441_v41, %v3272_v42  ;;  %v4621_v29 = vld [vmem:[#allocation5 + $0x7cc] sm:$0xf]  ;;  %v3867_v36 = vor.u32 %v4589_v26, %v3864_v27  ;;  %v3720_v42 = vld [vmem:[#allocation5 + $0x5b8] sm:$0xf0] }
  0xee   :  { %2099 = vmatpush.bf16.msra.mxu3 %v3467_v59  ;;  %v3403_v59 = vor.u32 %v4473_v46, %v3400_v48  ;;  %v5049_v14 = vpop.f32.mrf.mxu2  ;;  %v4521_v37 = vld [vmem:[#allocation5 + $0x4ac] sm:$0xf]  ;;  %v3848_v48 = vld [vmem:[#allocation5 + $0x6b8] sm:$0xf0] }
  0xef   :  { %2058 = vmatpush.bf16.msra.mxu0 %v3067_v2  ;;  %v4561_v2 = vld [vmem:[#allocation5 + $0x5ec] sm:$0xf]  ;;  %v3544_v25 = vld [vmem:[#allocation5 + $0x458] sm:$0xf0] }
  0xf0   :  { %2072 = vmatpush.bf16.msra.mxu1 %v3195_v4  ;;  %v3003_v4 = vor.u32 %v4373_v51, %v3000_v52  ;;  %v4553_v40 = vld [vmem:[#allocation5 + $0x5ac] sm:$0xf]  ;;  %v3976_v51 = vld [vmem:[#allocation5 + $0x7b8] sm:$0xf0] }
  0xf1   :  { %2086 = vmatpush.bf16.msra.mxu2 %v3323_v5  ;;  %v3752_v5 = vld [vmem:[#allocation5 + $0x5f8] sm:$0xf0]  ;;  %v4585_v46 = vld [vmem:[#allocation5 + $0x6ac] sm:$0xf] }
  0xf2   :  { %2100 = vmatpush.bf16.msra.mxu3 %v3451_v11  ;;  %v3259_v11 = vor.u32 %v4437_v57, %v3256_v60  ;;  %v5053_v28 = vpop.f32.mrf.mxu0  ;;  %v4517_v55 = vld [vmem:[#allocation5 + $0x48c] sm:$0xf]  ;;  %v3704_v60 = vld [vmem:[#allocation5 + $0x598] sm:$0xf0] }
  0xf3   :  { %2059 = vmatpush.bf16.msra.mxu0 %v3051_v18  ;;  %v5051_v18 = vpop.f32.mrf.mxu3  ;;  %v4581_v61 = vld [vmem:[#allocation5 + $0x68c] sm:$0xf] }
  0xf4   :  { %2073 = vmatpush.bf16.msra.mxu1 %v3179_v19  ;;  %v3755_v19 = vor.u32 %v4561_v2, %v3752_v5  ;;  %v4513_v5 = vld [vmem:[#allocation5 + $0x46c] sm:$0xf] }
  0xf5   :  { %2087 = vmatpush.bf16.msra.mxu2 %v3307_v20  ;;  %v3883_v20 = vor.u32 %v4593_v6, %v3880_v7  ;;  %v3560_v6 = vld [vmem:[#allocation5 + $0x478] sm:$0xf0]  ;;  %v4545_v7 = vld [vmem:[#allocation5 + $0x56c] sm:$0xf] }
  0xf6   :  { %2101 = vmatpush.bf16.msra.mxu3 %v3435_v24  ;;  %v4011_v24 = vor.u32 %v4625_v12, %v4008_v13  ;;  %v5061_v57 = vpop.f32.mrf.mxu2  ;;  %v3688_v12 = vld [vmem:[#allocation5 + $0x578] sm:$0xf0]  ;;  %v4577_v13 = vld [vmem:[#allocation5 + $0x66c] sm:$0xf] }
  0xf7   :  { %2060 = vmatpush.bf16.msra.mxu0 %v3035_v31  ;;  %v3992_v31 = vld [vmem:[#allocation5 + $0x7d8] sm:$0xf0]  ;;  %v4541_v26 = vld [vmem:[#allocation5 + $0x54c] sm:$0xf] }
  0xf8   :  { %2074 = vmatpush.bf16.msra.mxu1 %v3163_v33  ;;  %v5055_v33 = vpop.f32.mrf.mxu1  ;;  %v3995_v41 = vor.u32 %v4621_v29, %v3992_v31  ;;  %v3672_v29 = vld [vmem:[#allocation5 + $0x558] sm:$0xf0]  ;;  %v4573_v31 = vld [vmem:[#allocation5 + $0x64c] sm:$0xf] }
  0xf9   :  { %2088 = vmatpush.bf16.msra.mxu2 %v3291_v34  ;;  %v3611_v34 = vor.u32 %v4525_v21, %v3608_v22  ;;  %v3563_v21 = vor.u32 %v4513_v5, %v3560_v6  ;;  %v3691_v22 = vor.u32 %v4545_v7, %v3688_v12  ;;  %v3640_v5 = vld [vmem:[#allocation5 + $0x518] sm:$0xf0] }
  0xfa   :  { %2102 = vmatpush.bf16.msra.mxu3 %v3419_v38  ;;  %v3592_v38 = vld [vmem:[#allocation5 + $0x4b8] sm:$0xf0]  ;;  %v5065_v0 = vpop.f32.mrf.mxu0 }
  0xfb   :  { %2061 = vmatpush.bf16.msra.mxu0 %v3019_v50  ;;  %v4617_v50 = vld [vmem:[#allocation5 + $0x7ac] sm:$0xf]  ;;  %v3595_v52 = vor.u32 %v4521_v37, %v3592_v38  ;;  %v5063_v62 = vpop.f32.mrf.mxu3  ;;  %v3768_v12 = vld [vmem:[#allocation5 + $0x618] sm:$0xf0] }
  0xfc   :  { %2075 = vmatpush.bf16.msra.mxu1 %v3147_v53  ;;  %v3723_v53 = vor.u32 %v4553_v40, %v3720_v42  ;;  %v3675_v42 = vor.u32 %v4541_v26, %v3672_v29 }
  0xfd   :  { %2089 = vmatpush.bf16.msra.mxu2 %v3275_v54  ;;  %v3851_v54 = vor.u32 %v4585_v46, %v3848_v48 }
  0xfe   :  { %2103 = vmatpush.bf16.msra.mxu3 %v3403_v59  ;;  %v3979_v59 = vor.u32 %v4617_v50, %v3976_v51  ;;  %v5072_v38 = vpop.f32.mrf.mxu2  ;;  %v4505_v50 = vld [vmem:[#allocation5 + $0x42c] sm:$0xf]  ;;  %v3528_v51 = vld [vmem:[#allocation5 + $0x438] sm:$0xf0] }
  0xff   :  { %2062 = vmatpush.bf16.msra.mxu0 %v3003_v4 }
 0x100   :  { %2076 = vmatpush.bf16.msra.mxu1 %v3131_v8  ;;  %v5067_v8 = vpop.f32.mrf.mxu1 }
 0x101   :  { %2090 = vmatpush.bf16.msra.mxu2 %v3259_v11 }
 0x102   :  { %2104 = vmatpush.bf16.msra.mxu3 %v3387_v15  ;;  %2063 = vmatmul.bf16.vlgmr.msra.gmra.mxu0 %v4997_v58  ;;  %v3832_v58 = vld [vmem:[#allocation5 + $0x698] sm:$0xf0]  ;;  %v1840_v48 = vpop.f32.mrf.mxu0 }
 0x103   :  { %2111 = vmatpush.bf16.msrb.mxu0 %v3627_v16  ;;  %2077 = vmatmul.bf16.vlgmr.msra.gmra.mxu1 %v5003_v10  ;;  %v3579_v10 = vor.u32 %v4517_v55, %v3576_v56  ;;  %v3835_v4 = vor.u32 %v4581_v61, %v3832_v58  ;;  %v3816_v15 = vld [vmem:[#allocation5 + $0x678] sm:$0xf0]  ;;  %v4609_v16 = vld [vmem:[#allocation5 + $0x76c] sm:$0xf]  ;;  %v3531_v58 = vor.u32 %v4505_v50, %v3528_v51 }
 0x104   :  { %2125 = vmatpush.bf16.msrb.mxu1 %v3755_v19  ;;  %2091 = vmatmul.bf16.vlgmr.msra.gmra.mxu2 %v4999_v1  ;;  %v4549_v1 = vld [vmem:[#allocation5 + $0x58c] sm:$0xf]  ;;  %v3944_v19 = vld [vmem:[#allocation5 + $0x778] sm:$0xf0]  ;;  %v3819_v23 = vor.u32 %v4577_v13, %v3816_v15 }
 0x105   :  { %2139 = vmatpush.bf16.msrb.mxu2 %v3883_v20  ;;  %2105 = vmatmul.bf16.vlgmr.msra.gmra.mxu3 %v5005_v17  ;;  %v4613_v17 = vld [vmem:[#allocation5 + $0x78c] sm:$0xf]  ;;  %v3707_v2 = vor.u32 %v4549_v1, %v3704_v60  ;;  %v5069_v20 = vld [vmem:[#allocation7] sm:$0xf]  ;;  %v3947_v27 = vor.u32 %v4609_v16, %v3944_v19  ;;  %v3784_v56 = vld [vmem:[#allocation5 + $0x638] sm:$0xf0] }
 0x106   :  { %2153 = vmatpush.bf16.msrb.mxu3 %v4011_v24  ;;  %v3963_v11 = vor.u32 %v4613_v17, %v3960_v63  ;;  %v4509_v24 = vld [vmem:[#allocation5 + $0x44c] sm:$0xf]  ;;  %v391_v37 = vperm.slane %v5069_v20, 0  ;;  %v3912_v60 = vld [vmem:[#allocation5 + $0x738] sm:$0xf0]  ;;  %v392_v61 = vperm.slane %v5069_v20, 1 }
 0x107   :  { %2112 = vmatpush.bf16.msrb.mxu0 %v3611_v34  ;;  %v3800_v34 = vld [vmem:[#allocation5 + $0x658] sm:$0xf0]  ;;  %v3547_v40 = vor.u32 %v4509_v24, %v3544_v25  ;;  %v4569_v55 = vld [vmem:[#allocation5 + $0x62c] sm:$0xf]  ;;  %v4070_v16 = vld [vmem:[#allocation8 + $0x70] sm:$0xf]  ;;  %v1868_v25 = vpop.f32.mrf.mxu2 }
 0x108   :  { %2126 = vmatpush.bf16.msrb.mxu1 %v3739_v35  ;;  %v4605_v35 = vld [vmem:[#allocation5 + $0x74c] sm:$0xf]  ;;  %v3803_v46 = vor.u32 %v4573_v31, %v3800_v34  ;;  %v1854_v1 = vpop.f32.mrf.mxu1  ;;  %v1729_v6 = vadd.f32 %v5037_v3, %v391_v37  ;;  %v3896_v15 = vld [vmem:[#allocation5 + $0x718] sm:$0xf0]  ;;  %v1841_v26 = vadd.f32 %v1840_v48, %v392_v61 }
 0x109   :  { %2140 = vmatpush.bf16.msrb.mxu2 %v3867_v36  ;;  %v3928_v36 = vld [vmem:[#allocation5 + $0x758] sm:$0xf0]  ;;  %v4501_v17 = vld [vmem:[#allocation5 + $0x40c] sm:$0xf] }
 0x10a   :  { %2154 = vmatpush.bf16.msrb.mxu3 %v3995_v41  ;;  %v5074_v41 = vpop.f32.mrf.mxu3  ;;  %v4597_v13 = vld [vmem:[#allocation5 + $0x70c] sm:$0xf]  ;;  %v4643_v19 = vld [vmem:[#allocation8 + $0x74] sm:$0xf0]  ;;  %v1743_v31 = vadd.f32 %v5039_v9, %v1729_v6  ;;  %v1855_v51 = vadd.f32 %v1854_v1, %v1841_v26  ;;  %v4094_v26 = vld [vmem:[#allocation8 + $0xa0] sm:$0xf] }
 0x10b   :  { %2113 = vmatpush.bf16.msrb.mxu0 %v3595_v52  ;;  %v4537_v52 = vld [vmem:[#allocation5 + $0x52c] sm:$0xf]  ;;  %v4659_v24 = vld [vmem:[#allocation8 + $0xf4] sm:$0xf0]  ;;  %v3899_v34 = vor.u32 %v4597_v13, %v3896_v15  ;;  %v4102_v15 = vld [vmem:[#allocation8 + $0xb0] sm:$0xf] }
 0x10c   :  { %2127 = vmatpush.bf16.msrb.mxu1 %v3723_v53  ;;  %v3931_v53 = vor.u32 %v4605_v35, %v3928_v36  ;;  %v4071_v35 = vor.u32 %v4643_v19, %v4070_v16  ;;  %v4655_v1 = vld [vmem:[#allocation8 + $0xd4] sm:$0xf0] }
 0x10d   :  { %2141 = vmatpush.bf16.msrb.mxu2 %v3851_v54  ;;  %v3656_v54 = vld [vmem:[#allocation5 + $0x538] sm:$0xf0] }
 0x10e   :  { %2155 = vmatpush.bf16.msrb.mxu3 %v3979_v59  ;;  %v4601_v59 = vld [vmem:[#allocation5 + $0x72c] sm:$0xf]  ;;  %v3659_v63 = vor.u32 %v4537_v52, %v3656_v54  ;;  %v1757_v52 = vadd.f32 %v5041_v30, %v1743_v31  ;;  %v4635_v13 = vld [vmem:[#allocation8 + $0x34] sm:$0xf0] }
 0x10f   :  { %2114 = vmatpush.bf16.msrb.mxu0 %v3579_v10  ;;  %v3787_v10 = vor.u32 %v4569_v55, %v3784_v56  ;;  %v3915_v7 = vor.u32 %v4601_v59, %v3912_v60  ;;  %v4054_v55 = vld [vmem:[#allocation8 + $0x50] sm:$0xf]  ;;  %v4639_v56 = vld [vmem:[#allocation8 + $0x54] sm:$0xf0]  ;;  %v1869_v60 = vadd.f32 %v1868_v25, %v1855_v51  ;;  %v4633_v25 = vld [vmem:[#allocation8 + $0x24] sm:$0xf0] }
 0x110   :  { %2128 = vmatpush.bf16.msrb.mxu1 %v3707_v2  ;;  %v3512_v2 = vld [vmem:[#allocation5 + $0x418] sm:$0xf0]  ;;  %v1856_v50 = vpop.f32.mrf.mxu1  ;;  %v1771_v30 = vadd.f32 %v5043_v32, %v1757_v52  ;;  %v4086_v51 = vld [vmem:[#allocation8 + $0x90] sm:$0xf] }
 0x111   :  { %2142 = vmatpush.bf16.msrb.mxu2 %v3835_v4  ;;  %v4533_v4 = vld [vmem:[#allocation5 + $0x50c] sm:$0xf]  ;;  %v4651_v16 = vld [vmem:[#allocation8 + $0xb4] sm:$0xf0] }
 0x112   :  { %2156 = vmatpush.bf16.msrb.mxu3 %v3963_v11  ;;  %v4565_v11 = vld [vmem:[#allocation5 + $0x60c] sm:$0xf]  ;;  %v1882_v29 = vpop.f32.mrf.mxu3  ;;  %v1785_v6 = vadd.f32 %v5053_v28, %v1771_v30  ;;  %v4103_v28 = vor.u32 %v4651_v16, %v4102_v15  ;;  %v4675_v31 = vld [vmem:[#allocation8 + $0x174] sm:$0xf0]  ;;  %v4078_v30 = vld [vmem:[#allocation8 + $0x80] sm:$0xf] }
 0x113   :  { %2115 = vmatpush.bf16.msrb.mxu0 %v3563_v21  ;;  %v1731_v21 = vadd.f32 %v5045_v45, %v391_v37  ;;  %v3771_v3 = vor.u32 %v4565_v11, %v3768_v12  ;;  %v4641_v45 = vld [vmem:[#allocation8 + $0x64] sm:$0xf0]  ;;  %v4126_v37 = vld [vmem:[#allocation8 + $0xe0] sm:$0xf]  ;;  %v4038_v12 = vld [vmem:[#allocation8 + $0x30] sm:$0xf] }
 0x114   :  { %2129 = vmatpush.bf16.msrb.mxu1 %v3691_v22  ;;  %v3515_v22 = vor.u32 %v4501_v17, %v3512_v2  ;;  %v4110_v2 = vld [vmem:[#allocation8 + $0xc0] sm:$0xf]  ;;  %v4669_v16 = vld [vmem:[#allocation8 + $0x144] sm:$0xf0] }
 0x115   :  { %2143 = vmatpush.bf16.msrb.mxu2 %v3819_v23  ;;  %v4134_v23 = vld [vmem:[#allocation8 + $0xf0] sm:$0xf]  ;;  %v1745_v48 = vadd.f32 %v5047_v49, %v1731_v21  ;;  %v4174_v15 = vld [vmem:[#allocation8 + $0x140] sm:$0xf] }
 0x116   :  { %2157 = vmatpush.bf16.msrb.mxu3 %v3947_v27  ;;  %v3643_v27 = vor.u32 %v4533_v4, %v3640_v5  ;;  %v4135_v36 = vor.u32 %v4659_v24, %v4134_v23  ;;  %v4118_v49 = vld [vmem:[#allocation8 + $0xd0] sm:$0xf]  ;;  %v1883_v5 = vadd.f32 %v1882_v29, %v1869_v60  ;;  %v4030_v24 = vld [vmem:[#allocation8 + $0x20] sm:$0xf] }
 0x117   :  { %2116 = vmatpush.bf16.msrb.mxu0 %v3547_v40  ;;  %v1842_v40 = vpop.f32.mrf.mxu0  ;;  %v1759_v59 = vadd.f32 %v5049_v14, %v1745_v48  ;;  %v4119_v17 = vor.u32 %v4655_v1, %v4118_v49  ;;  %v4198_v29 = vld [vmem:[#allocation8 + $0x170] sm:$0xf]  ;;  %v4631_v48 = vld [vmem:[#allocation8 + $0x14] sm:$0xf0]  ;;  %v4014_v49 = vld [vmem:[#allocation8] sm:$0xf] }
 0x118   :  { %2130 = vmatpush.bf16.msrb.mxu1 %v3675_v42  ;;  %v4062_v42 = vld [vmem:[#allocation8 + $0x60] sm:$0xf]  ;;  %v4629_v1 = vld [vmem:[#allocation8 + $0x4] sm:$0xf0] }
 0x119   :  { %2144 = vmatpush.bf16.msrb.mxu2 %v3803_v46  ;;  %v4657_v46 = vld [vmem:[#allocation8 + $0xe4] sm:$0xf0]  ;;  %v4063_v9 = vor.u32 %v4641_v45, %v4062_v42  ;;  %v1773_v4 = vadd.f32 %v5051_v18, %v1759_v59  ;;  %v4039_v18 = vor.u32 %v4635_v13, %v4038_v12  ;;  %v4031_v42 = vor.u32 %v4633_v25, %v4030_v24  ;;  %v4064_v13 = vld [vmem:[#allocation8 + $0x68] sm:$0xf0] }
 0x11a   :  { %2158 = vmatpush.bf16.msrb.mxu3 %v3931_v53  ;;  %v1843_v53 = vadd.f32 %v1842_v40, %v392_v61  ;;  %v4127_v54 = vor.u32 %v4657_v46, %v4126_v37  ;;  %v4199_v40 = vor.u32 %v4675_v31, %v4198_v29  ;;  %v4638_v29 = vld [vmem:[#allocation8 + $0x54] sm:$0xf]  ;;  %v4056_v31 = vld [vmem:[#allocation8 + $0x58] sm:$0xf0] }
 0x11b   :  { %2117 = vmatpush.bf16.msrb.mxu0 %v3531_v58  ;;  %v4055_v58 = vor.u32 %v4639_v56, %v4054_v55  ;;  %v1787_v19 = vadd.f32 %v5065_v0, %v1773_v4  ;;  %v4136_v4 = vld [vmem:[#allocation8 + $0xf8] sm:$0xf0] }
 0x11c   :  { %2131 = vmatpush.bf16.msrb.mxu1 %v3659_v63  ;;  %v1857_v61 = vadd.f32 %v1856_v50, %v1843_v53  ;;  %v1884_v63 = vpop.f32.mrf.mxu3  ;;  %v4022_v50 = vld [vmem:[#allocation8 + $0x10] sm:$0xf]  ;;  %v4673_v53 = vld [vmem:[#allocation8 + $0x164] sm:$0xf0] }
 0x11d   :  { %2145 = vmatpush.bf16.msrb.mxu2 %v3787_v10  ;;  %v4046_v10 = vld [vmem:[#allocation8 + $0x40] sm:$0xf] }
 0x11e   :  { %2159 = vmatpush.bf16.msrb.mxu3 %v3915_v7 }
 0x11f   :  { %2118 = vmatpush.bf16.msrb.mxu0 %v3515_v22  ;;  %v1896_v14 = vpop.f32.mrf.mxu0  ;;  %v1799_v22 = vadd.f32 %v5055_v33, %v1785_v6 }
 0x120   :  { %2132 = vmatpush.bf16.msrb.mxu1 %v3643_v27  ;;  %v1910_v32 = vpop.f32.mrf.mxu1  ;;  %v1897_v21 = vadd.f32 %v1896_v14, %v1883_v5 }
 0x121   :  { %2146 = vmatpush.bf16.msrb.mxu2 %v3771_v3  ;;  %v4649_v3 = vld [vmem:[#allocation8 + $0xa4] sm:$0xf0]  ;;  %v1813_v33 = vadd.f32 %v5061_v57, %v1799_v22  ;;  %v4023_v57 = vor.u32 %v4631_v48, %v4022_v50  ;;  %v4656_v22 = vld [vmem:[#allocation8 + $0xe4] sm:$0xf]  ;;  %v4112_v48 = vld [vmem:[#allocation8 + $0xc8] sm:$0xf0] }
 0x122   :  { %2160 = vmatpush.bf16.msrb.mxu3 %v3899_v34  ;;  %2119 = vmatmul.bf16.vlgmr.msrb.gmra.mxu0 %v5009_v39  ;;  %v1870_v39 = vpop.f32.mrf.mxu2  ;;  %v1801_v34 = vadd.f32 %v5067_v8, %v1787_v19  ;;  %v4095_v46 = vor.u32 %v4649_v3, %v4094_v26  ;;  %v4190_v8 = vld [vmem:[#allocation8 + $0x160] sm:$0xf]  ;;  %v4166_v26 = vld [vmem:[#allocation8 + $0x130] sm:$0xf]  ;;  %v4652_v50 = vld [vmem:[#allocation8 + $0xc4] sm:$0xf] }
 0x123   :  { %2569 = vmatpush.bf16.msra.mxu0 %v4071_v35  ;;  %2133 = vmatmul.bf16.vlgmr.msrb.gmra.mxu1 %v5013_v44  ;;  %v4637_v44 = vld [vmem:[#allocation8 + $0x44] sm:$0xf0]  ;;  %v1871_v7 = vadd.f32 %v1870_v39, %v1857_v61  ;;  %v1911_v35 = vadd.f32 %v1910_v32, %v1897_v21  ;;  %v4191_v55 = vor.u32 %v4673_v53, %v4190_v8  ;;  %v4642_v39 = vld [vmem:[#allocation8 + $0x74] sm:$0xf]  ;;  %v4040_v8 = vld [vmem:[#allocation8 + $0x38] sm:$0xf0] }
 0x124   :  { %2583 = vmatpush.bf16.msra.mxu1 %v4135_v36  ;;  %2147 = vmatmul.bf16.vlgmr.msrb.gmra.mxu2 %v5011_v43  ;;  %v4653_v43 = vld [vmem:[#allocation8 + $0xc4] sm:$0xf0]  ;;  %v1815_v45 = vadd.f32 %v5072_v38, %v1801_v34  ;;  %v1827_v56 = vadd.f32 %v5063_v62, %v1813_v33  ;;  %v4654_v34 = vld [vmem:[#allocation8 + $0xd4] sm:$0xf]  ;;  %v4059_v33 = vor.u32 %v4638_v29, %v4056_v31  ;;  %v4150_v53 = vld [vmem:[#allocation8 + $0x110] sm:$0xf] }
 0x125   :  { %2161 = vmatmul.bf16.vlgmr.msrb.gmra.mxu3 %v5015_v47  ;;  %v4047_v47 = vor.u32 %v4637_v44, %v4046_v10  ;;  %v4111_v11 = vor.u32 %v4653_v43, %v4110_v2  ;;  %v1885_v23 = vadd.f32 %v1884_v63, %v1871_v7  ;;  %2597 = vmatpush.bf16.msra.mxu2 %v4199_v40  ;;  %v4182_v63 = vld [vmem:[#allocation8 + $0x150] sm:$0xf]  ;;  %v4671_v10 = vld [vmem:[#allocation8 + $0x154] sm:$0xf0]  ;;  %v4658_v43 = vld [vmem:[#allocation8 + $0xf4] sm:$0xf] }
 0x126   :  { %v1829_v38 = vadd.f32 %v5074_v41, %v1815_v45  ;;  %v4183_v5 = vor.u32 %v4671_v10, %v4182_v63  ;;  %v2167_v14 = vmax.f32 %v1827_v56, 0.0  ;;  %v4015_v41 = vor.u32 %v4629_v1, %v4014_v49  ;;  %v4665_v40 = vld [vmem:[#allocation8 + $0x124] sm:$0xf0]  ;;  %v4636_v45 = vld [vmem:[#allocation8 + $0x44] sm:$0xf] }
 0x127   :  { %2570 = vmatpush.bf16.msra.mxu0 %v4063_v9  ;;  %v1898_v36 = vpop.f32.mrf.mxu0  ;;  %v4647_v9 = vld [vmem:[#allocation8 + $0x94] sm:$0xf0]  ;;  %v4139_v12 = vor.u32 %v4658_v43, %v4136_v4  ;;  %v4104_v56 = vld [vmem:[#allocation8 + $0xb8] sm:$0xf0]  ;;  %v4632_v1 = vld [vmem:[#allocation8 + $0x24] sm:$0xf] }
 0x128   :  { %2584 = vmatpush.bf16.msra.mxu1 %v4127_v54  ;;  %v1938_v0 = vpop.f32.mrf.mxu3  ;;  %v1899_v37 = vadd.f32 %v1898_v36, %v1885_v23  ;;  %v1912_v52 = vpop.f32.mrf.mxu1  ;;  %v4087_v60 = vor.u32 %v4647_v9, %v4086_v51  ;;  %v2171_v6 = vmax.f32 %v1829_v38, 0.0  ;;  %v4175_v23 = vor.u32 %v4669_v16, %v4174_v15  ;;  %v4120_v36 = vld [vmem:[#allocation8 + $0xd8] sm:$0xf0]  ;;  %v4032_v38 = vld [vmem:[#allocation8 + $0x28] sm:$0xf0] }
 0x129   :  { %2598 = vmatpush.bf16.msra.mxu2 %v4191_v55  ;;  %v4115_v9 = vor.u32 %v4652_v50, %v4112_v48  ;;  %v4650_v55 = vld [vmem:[#allocation8 + $0xb4] sm:$0xf]  ;;  %v4200_v63 = vld [vmem:[#allocation8 + $0x178] sm:$0xf0]  ;;  %v4016_v15 = vld [vmem:[#allocation8 + $0x8] sm:$0xf0] }
 0x12a   :  { %v1924_v27 = vpop.f32.mrf.mxu2  ;;  %v1913_v59 = vadd.f32 %v1912_v52, %v1899_v37  ;;  %v4048_v37 = vld [vmem:[#allocation8 + $0x48] sm:$0xf0]  ;;  %v4634_v52 = vld [vmem:[#allocation8 + $0x34] sm:$0xf]  ;;  %v4024_v43 = vld [vmem:[#allocation8 + $0x18] sm:$0xf0] }
 0x12b   :  { %2571 = vmatpush.bf16.msra.mxu0 %v4055_v58  ;;  %v1925_v54 = vadd.f32 %v1924_v27, %v1911_v35  ;;  %v4645_v58 = vld [vmem:[#allocation8 + $0x84] sm:$0xf0]  ;;  %v4667_v27 = vld [vmem:[#allocation8 + $0x134] sm:$0xf0]  ;;  %v4051_v51 = vor.u32 %v4636_v45, %v4048_v37  ;;  %v4043_v49 = vor.u32 %v4634_v52, %v4040_v8  ;;  %v4646_v4 = vld [vmem:[#allocation8 + $0x94] sm:$0xf] }
 0x12c   :  { %2585 = vmatpush.bf16.msra.mxu1 %v4119_v17  ;;  %v4072_v17 = vld [vmem:[#allocation8 + $0x78] sm:$0xf0]  ;;  %v4079_v32 = vor.u32 %v4645_v58, %v4078_v30  ;;  %v4167_v35 = vor.u32 %v4667_v27, %v4166_v26  ;;  %v4142_v30 = vld [vmem:[#allocation8 + $0x100] sm:$0xf]  ;;  %v4661_v58 = vld [vmem:[#allocation8 + $0x104] sm:$0xf0] }
 0x12d   :  { %v1939_v44 = vadd.f32 %v1938_v0, %v1925_v54  ;;  %v4075_v7 = vor.u32 %v4642_v39, %v4072_v17  ;;  %2599 = vmatpush.bf16.msra.mxu2 %v4183_v5  ;;  %v4158_v0 = vld [vmem:[#allocation8 + $0x120] sm:$0xf]  ;;  %v4663_v54 = vld [vmem:[#allocation8 + $0x114] sm:$0xf0]  ;;  %v4096_v39 = vld [vmem:[#allocation8 + $0xa8] sm:$0xf0] }
 0x12e   :  { %v4674_v17 = vld [vmem:[#allocation8 + $0x174] sm:$0xf]  ;;  %v4644_v16 = vld [vmem:[#allocation8 + $0x84] sm:$0xf]  ;;  %v4176_v31 = vld [vmem:[#allocation8 + $0x148] sm:$0xf0] }
 0x12f   :  { %2572 = vmatpush.bf16.msra.mxu0 %v4047_v47  ;;  %v2168_v19 = vmax.f32 %v1939_v44, 0.0  ;;  %v4203_v10 = vor.u32 %v4674_v17, %v4200_v63  ;;  %v4035_v44 = vor.u32 %v4632_v1, %v4032_v38  ;;  %v4668_v29 = vld [vmem:[#allocation8 + $0x144] sm:$0xf]  ;;  %v4160_v37 = vld [vmem:[#allocation8 + $0x128] sm:$0xf0] }
 0x130   :  { %2586 = vmatpush.bf16.msra.mxu1 %v4111_v11  ;;  %v1940_v62 = vpop.f32.mrf.mxu3  ;;  %v4640_v11 = vld [vmem:[#allocation8 + $0x64] sm:$0xf]  ;;  %v4662_v52 = vld [vmem:[#allocation8 + $0x114] sm:$0xf]  ;;  %v4144_v1 = vld [vmem:[#allocation8 + $0x108] sm:$0xf0] }
 0x131   :  { %v4067_v25 = vor.u32 %v4640_v11, %v4064_v13  ;;  %2600 = vmatpush.bf16.msra.mxu2 %v4175_v23  ;;  %v4628_v13 = vld [vmem:[#allocation8 + $0x4] sm:$0xf]  ;;  %v4691_v38 = vld [vmem:[#allocation8 + $0x1f4] sm:$0xf0] }
 0x132   :  { %v1926_v61 = vpop.f32.mrf.mxu2  ;;  %v4019_v23 = vor.u32 %v4628_v13, %v4016_v15  ;;  %v4664_v45 = vld [vmem:[#allocation8 + $0x124] sm:$0xf] }
 0x133   :  { %2573 = vmatpush.bf16.msra.mxu0 %v4039_v18  ;;  %v1927_v2 = vadd.f32 %v1926_v61, %v1913_v59  ;;  %v4128_v18 = vld [vmem:[#allocation8 + $0xe8] sm:$0xf0]  ;;  %v4107_v59 = vor.u32 %v4650_v55, %v4104_v56  ;;  %v4143_v61 = vor.u32 %v4661_v58, %v4142_v30  ;;  %v4163_v48 = vor.u32 %v4664_v45, %v4160_v37  ;;  %v4688_v45 = vld [vmem:[#allocation8 + $0x1e4] sm:$0xf] }
 0x134   :  { %2587 = vmatpush.bf16.msra.mxu1 %v4103_v28  ;;  %v5097_v28 = vpack.c.bf16 %v2171_v6, %v2167_v14  ;;  %v4131_v3 = vor.u32 %v4656_v22, %v4128_v18  ;;  %v4088_v14 = vld [vmem:[#allocation8 + $0x98] sm:$0xf0]  ;;  %v4192_v6 = vld [vmem:[#allocation8 + $0x168] sm:$0xf0] }
 0x135   :  { %v1941_v47 = vadd.f32 %v1940_v62, %v1927_v2  ;;  %2601 = vmatpush.bf16.msra.mxu2 %v4167_v35  ;;  %v4630_v62 = vld [vmem:[#allocation8 + $0x14] sm:$0xf]  ;;  %v4184_v22 = vld [vmem:[#allocation8 + $0x158] sm:$0xf0]  ;;  %v4256_v37 = vld [vmem:[#allocation8 + $0x1e8] sm:$0xf0] }
 0x136   :  { %v4027_v11 = vor.u32 %v4630_v62, %v4024_v43  ;;  %v4687_v43 = vld [vmem:[#allocation8 + $0x1d4] sm:$0xf0] }
 0x137   :  { %2574 = vmatpush.bf16.msra.mxu0 %v4031_v42  ;;  %v2172_v21 = vmax.f32 %v1941_v47, 0.0  ;;  %v4123_v42 = vor.u32 %v4654_v34, %v4120_v36  ;;  %v4179_v34 = vor.u32 %v4668_v29, %v4176_v31  ;;  %v4214_v29 = vld [vmem:[#allocation8 + $0x190] sm:$0xf]  ;;  %v4679_v31 = vld [vmem:[#allocation8 + $0x194] sm:$0xf0] }
 0x138   :  { %2588 = vmatpush.bf16.msra.mxu1 %v4095_v46  ;;  %v4159_v46 = vor.u32 %v4665_v40, %v4158_v0  ;;  %v4666_v40 = vld [vmem:[#allocation8 + $0x134] sm:$0xf] }
 0x139   :  { %v5099_v24 = vpack.c.bf16 %v2172_v21, %v2168_v19  ;;  %v4080_v19 = vld [vmem:[#allocation8 + $0x88] sm:$0xf0]  ;;  %v4670_v21 = vld [vmem:[#allocation8 + $0x154] sm:$0xf] }
 0x13a   :  { %2602 = vmatpush.bf16.msra.mxu2 %v4159_v46  ;;  %v4187_v18 = vor.u32 %v4670_v21, %v4184_v22 }
 0x13b   :  { %2575 = vmatpush.bf16.msra.mxu0 %v4023_v57  ;;  %v4151_v57 = vor.u32 %v4663_v54, %v4150_v53 }
 0x13c   :  { %2589 = vmatpush.bf16.msra.mxu1 %v4087_v60  ;;  %v4648_v60 = vld [vmem:[#allocation8 + $0xa4] sm:$0xf] }
 0x13d   :  { %v4099_v2 = vor.u32 %v4648_v60, %v4096_v39 }
 0x13e   :  { %2603 = vmatpush.bf16.msra.mxu2 %v4151_v57  ;;  %v4262_v57 = vld [vmem:[#allocation8 + $0x1f0] sm:$0xf] }
 0x13f   :  { %2576 = vmatpush.bf16.msra.mxu0 %v4015_v41  ;;  %v1952_v5 = vpop.f32.mrf.mxu0  ;;  %v4672_v41 = vld [vmem:[#allocation8 + $0x164] sm:$0xf] }
 0x140   :  { %2590 = vmatpush.bf16.msra.mxu1 %v4079_v32  ;;  %v1966_v47 = vpop.f32.mrf.mxu1  ;;  %v4195_v32 = vor.u32 %v4672_v41, %v4192_v6  ;;  %v4238_v6 = vld [vmem:[#allocation8 + $0x1c0] sm:$0xf] }
 0x142   :  { %2577 = vmatmul.bf16.vlgmr.msra.gmra.mxu0 %v5097_v28  ;;  %2604 = vmatpush.bf16.msra.mxu2 %v4143_v61 }
 0x143   :  { %2625 = vmatpush.bf16.msrb.mxu0 %v4075_v7  ;;  %2591 = vmatmul.bf16.vlgmr.msra.gmra.mxu1 %v5099_v24  ;;  %v393_v7 = vperm.slane %v5069_v20, 2 }
 0x144   :  { %2639 = vmatpush.bf16.msrb.mxu1 %v4139_v12  ;;  %v4091_v12 = vor.u32 %v4646_v4, %v4088_v14 }
 0x145   :  { %v1953_v27 = vadd.f32 %v1952_v5, %v393_v7 }
 0x146   :  { %2653 = vmatpush.bf16.msrb.mxu2 %v4203_v10  ;;  %v4254_v10 = vld [vmem:[#allocation8 + $0x1e0] sm:$0xf] }
 0x147   :  { %2626 = vmatpush.bf16.msrb.mxu0 %v4067_v25  ;;  %v4083_v25 = vor.u32 %v4644_v16, %v4080_v19  ;;  %v1980_v26 = vpop.f32.mrf.mxu2  ;;  %v1954_v35 = vpop.f32.mrf.mxu0  ;;  %v1967_v0 = vadd.f32 %v1966_v47, %v1953_v27  ;;  %v4685_v47 = vld [vmem:[#allocation8 + $0x1c4] sm:$0xf0]  ;;  %v4230_v16 = vld [vmem:[#allocation8 + $0x1b0] sm:$0xf]  ;;  %v4683_v19 = vld [vmem:[#allocation8 + $0x1b4] sm:$0xf0] }
 0x148   :  { %2640 = vmatpush.bf16.msrb.mxu1 %v4131_v3  ;;  %v1994_v3 = vpop.f32.mrf.mxu3  ;;  %v1968_v36 = vpop.f32.mrf.mxu1  ;;  %v1955_v46 = vadd.f32 %v1954_v35, %v393_v7  ;;  %v4231_v22 = vor.u32 %v4683_v19, %v4230_v16  ;;  %v4206_v35 = vld [vmem:[#allocation8 + $0x180] sm:$0xf] }
 0x149   :  { %v1981_v50 = vadd.f32 %v1980_v26, %v1967_v0  ;;  %v4681_v26 = vld [vmem:[#allocation8 + $0x1a4] sm:$0xf0] }
 0x14a   :  { %2654 = vmatpush.bf16.msrb.mxu2 %v4195_v32  ;;  %v1969_v8 = vadd.f32 %v1968_v36, %v1955_v46  ;;  %v4677_v36 = vld [vmem:[#allocation8 + $0x184] sm:$0xf0]  ;;  %v4259_v46 = vor.u32 %v4688_v45, %v4256_v37  ;;  %v4706_v45 = vld [vmem:[#allocation10 + $0x70] sm:$0xff] }
 0x14b   :  { %2627 = vmatpush.bf16.msrb.mxu0 %v4059_v33  ;;  %v4168_v33 = vld [vmem:[#allocation8 + $0x138] sm:$0xf0]  ;;  %v1995_v54 = vadd.f32 %v1994_v3, %v1981_v50  ;;  %v4207_v0 = vor.u32 %v4677_v36, %v4206_v35  ;;  %v4698_v35 = vld [vmem:[#allocation10 + $0x30] sm:$0xff]  ;;  %v4697_v36 = vld [vmem:[#allocation10 + $0x28] sm:$0xff] }
 0x14c   :  { %2641 = vmatpush.bf16.msrb.mxu1 %v4123_v42  ;;  %v4171_v42 = vor.u32 %v4666_v40, %v4168_v33  ;;  %v4690_v40 = vld [vmem:[#allocation8 + $0x1f4] sm:$0xf]  ;;  %v4264_v33 = vld [vmem:[#allocation8 + $0x1f8] sm:$0xf0]  ;;  %v4693_v37 = vld [vmem:[#allocation10 + $0x8] sm:$0xff] }
 0x14e   :  { %2655 = vmatpush.bf16.msrb.mxu2 %v4187_v18 }
 0x14f   :  { %2628 = vmatpush.bf16.msrb.mxu0 %v4051_v51  ;;  %v1982_v51 = vpop.f32.mrf.mxu2 }
 0x150   :  { %2642 = vmatpush.bf16.msrb.mxu1 %v4115_v9  ;;  %v4152_v9 = vld [vmem:[#allocation8 + $0x118] sm:$0xf0]  ;;  %v1996_v53 = vpop.f32.mrf.mxu3 }
 0x151   :  { %v4155_v56 = vor.u32 %v4662_v52, %v4152_v9 }
 0x152   :  { %2656 = vmatpush.bf16.msrb.mxu2 %v4179_v34  ;;  %v4215_v34 = vor.u32 %v4679_v31, %v4214_v29 }
 0x153   :  { %2629 = vmatpush.bf16.msrb.mxu0 %v4043_v49  ;;  %v4660_v49 = vld [vmem:[#allocation8 + $0x104] sm:$0xf] }
 0x154   :  { %2643 = vmatpush.bf16.msrb.mxu1 %v4107_v59  ;;  %v1983_v59 = vadd.f32 %v1982_v51, %v1969_v8  ;;  %v4147_v30 = vor.u32 %v4660_v49, %v4144_v1  ;;  %v4248_v51 = vld [vmem:[#allocation8 + $0x1d8] sm:$0xf0]  ;;  %v4684_v8 = vld [vmem:[#allocation8 + $0x1c4] sm:$0xf] }
 0x155   :  { %v4232_v49 = vld [vmem:[#allocation8 + $0x1b8] sm:$0xf0] }
 0x156   :  { %2657 = vmatpush.bf16.msrb.mxu2 %v4171_v42  ;;  %v1997_v58 = vadd.f32 %v1996_v53, %v1983_v59  ;;  %v4267_v42 = vor.u32 %v4690_v40, %v4264_v33  ;;  %v4240_v53 = vld [vmem:[#allocation8 + $0x1c8] sm:$0xf0]  ;;  %v4695_v40 = vld [vmem:[#allocation10 + $0x18] sm:$0xff] }
 0x157   :  { %2630 = vmatpush.bf16.msrb.mxu0 %v4035_v44  ;;  %v4689_v44 = vld [vmem:[#allocation8 + $0x1e4] sm:$0xf0]  ;;  %v4707_v33 = vld [vmem:[#allocation10 + $0x78] sm:$0xff] }
 0x158   :  { %2644 = vmatpush.bf16.msrb.mxu1 %v4099_v2  ;;  %v4246_v2 = vld [vmem:[#allocation8 + $0x1d0] sm:$0xf]  ;;  %v4255_v62 = vor.u32 %v4689_v44, %v4254_v10 }
 0x159   :  { %v4247_v14 = vor.u32 %v4687_v43, %v4246_v2 }
 0x15a   :  { %2658 = vmatpush.bf16.msrb.mxu2 %v4163_v48  ;;  %v4686_v48 = vld [vmem:[#allocation8 + $0x1d4] sm:$0xf] }
 0x15b   :  { %2631 = vmatpush.bf16.msrb.mxu0 %v4027_v11  ;;  %v4239_v11 = vor.u32 %v4685_v47, %v4238_v6  ;;  %v4251_v52 = vor.u32 %v4686_v48, %v4248_v51  ;;  %v4704_v48 = vld [vmem:[#allocation10 + $0x60] sm:$0xff]  ;;  %v4703_v51 = vld [vmem:[#allocation10 + $0x58] sm:$0xff] }
 0x15c   :  { %2645 = vmatpush.bf16.msrb.mxu1 %v4091_v12 }
 0x15e   :  { %2659 = vmatpush.bf16.msrb.mxu2 %v4155_v56 }
 0x15f   :  { %2632 = vmatpush.bf16.msrb.mxu0 %v4019_v23  ;;  %v2008_v55 = vpop.f32.mrf.mxu0 }
 0x160   :  { %2646 = vmatpush.bf16.msrb.mxu1 %v4083_v25  ;;  %v2009_v60 = vadd.f32 %v2008_v55, %v1995_v54  ;;  %v4222_v25 = vld [vmem:[#allocation8 + $0x1a0] sm:$0xf]  ;;  %v394_v54 = vperm.slane %v5069_v20, 3  ;;  %v4243_v55 = vor.u32 %v4684_v8, %v4240_v53  ;;  %v4216_v20 = vld [vmem:[#allocation8 + $0x198] sm:$0xf0]  ;;  %v4701_v53 = vld [vmem:[#allocation10 + $0x48] sm:$0xff] }
 0x161   :  { %v4223_v3 = vor.u32 %v4681_v26, %v4222_v25 }
 0x162   :  { %2633 = vmatmul.bf16.vlgmr.msrb.gmra.mxu0 %v5097_v28  ;;  %v2022_v28 = vpop.f32.mrf.mxu1  ;;  %2660 = vmatpush.bf16.msrb.mxu2 %v4147_v30 }
 0x163   :  { %2647 = vmatmul.bf16.vlgmr.msrb.gmra.mxu1 %v5099_v24  ;;  %v4263_v24 = vor.u32 %v4691_v38, %v4262_v57  ;;  %v2023_v61 = vadd.f32 %v2022_v28, %v2009_v60  ;;  %v4682_v28 = vld [vmem:[#allocation8 + $0x1b4] sm:$0xf]  ;;  %v4224_v60 = vld [vmem:[#allocation8 + $0x1a8] sm:$0xf0] }
 0x164   :  { %v4235_v59 = vor.u32 %v4682_v28, %v4232_v49  ;;  %2833 = vmatpush.bf16.msra.mxu1 %v4707_v33 }
 0x165   :  { %2611 = vmatpush.bf16.msra.mxu3 %v4263_v24  ;;  %v4680_v24 = vld [vmem:[#allocation8 + $0x1a4] sm:$0xf] }
 0x166   :  { %v4227_v30 = vor.u32 %v4680_v24, %v4224_v60 }
 0x167   :  { %v2036_v39 = vpop.f32.mrf.mxu2  ;;  %v2010_v17 = vpop.f32.mrf.mxu0 }
 0x168   :  { %v2050_v63 = vpop.f32.mrf.mxu3  ;;  %v2011_v4 = vadd.f32 %v2010_v17, %v1997_v58  ;;  %v2037_v41 = vadd.f32 %v2036_v39, %v2023_v61  ;;  %2834 = vmatpush.bf16.msra.mxu1 %v4706_v45 }
 0x169   :  { %2612 = vmatpush.bf16.msra.mxu3 %v4255_v62 }
 0x16a   :  { %v2024_v5 = vpop.f32.mrf.mxu1  ;;  %v2051_v12 = vadd.f32 %v2050_v63, %v2037_v41  ;;  %v4678_v63 = vld [vmem:[#allocation8 + $0x194] sm:$0xf] }
 0x16b   :  { %v2025_v32 = vadd.f32 %v2024_v5, %v2011_v4  ;;  %v4219_v43 = vor.u32 %v4678_v63, %v4216_v20  ;;  %v4676_v4 = vld [vmem:[#allocation8 + $0x184] sm:$0xf]  ;;  %v4208_v5 = vld [vmem:[#allocation8 + $0x188] sm:$0xf0] }
 0x16c   :  { %v2169_v18 = vmax.f32 %v2051_v12, 0.0 }
 0x16d   :  { %2613 = vmatpush.bf16.msra.mxu3 %v4247_v14  ;;  %v4211_v14 = vor.u32 %v4676_v4, %v4208_v5 }
 0x16f   :  { %v2038_v7 = vpop.f32.mrf.mxu2 }
 0x170   :  { %v2039_v13 = vadd.f32 %v2038_v7, %v2025_v32  ;;  %v2052_v15 = vpop.f32.mrf.mxu3 }
 0x171   :  { %2614 = vmatpush.bf16.msra.mxu3 %v4239_v11 }
 0x172   :  { %v2053_v21 = vadd.f32 %v2052_v15, %v2039_v13 }
 0x174   :  { %v2173_v23 = vmax.f32 %v2053_v21, 0.0 }
 0x175   :  { %2615 = vmatpush.bf16.msra.mxu3 %v4231_v22 }
 0x176   :  { %v2177_v27 = vpack.c.bf16 %v2173_v23, %v2169_v18 }
 0x178   :  { %2605 = vmatmul.bf16.vlgmr.msra.gmra.mxu2 %v2177_v27 }
 0x179   :  { %2616 = vmatpush.bf16.msra.mxu3 %v4223_v3 }
 0x17d   :  { %2617 = vmatpush.bf16.msra.mxu3 %v4215_v34  ;;  %v4699_v34 = vld [vmem:[#allocation10 + $0x38] sm:$0xff] }
 0x17e   :  { %2819 = vmatpush.bf16.msra.mxu0 %v4699_v34  ;;  %v4708_v34 = vld [vmem:[#allocation11] sm:$0xff] }
 0x17f   :  { %v2064_v50 = vpop.f32.mrf.mxu0 }
 0x180   :  { %v2078_v9 = vpop.f32.mrf.mxu1  ;;  %v2065_v1 = vadd.f32 %v2064_v50, %v394_v54  ;;  %v4692_v50 = vld [vmem:[#allocation10] sm:$0xff] }
 0x181   :  { %2618 = vmatpush.bf16.msra.mxu3 %v4207_v0  ;;  %v4696_v0 = vld [vmem:[#allocation10 + $0x20] sm:$0xff] }
 0x182   :  { %v2079_v39 = vadd.f32 %v2078_v9, %v2065_v1  ;;  %2820 = vmatpush.bf16.msra.mxu0 %v4698_v35  ;;  %v4702_v9 = vld [vmem:[#allocation10 + $0x50] sm:$0xff] }
 0x185   :  { %2667 = vmatpush.bf16.msrb.mxu3 %v4267_v42  ;;  %v4694_v42 = vld [vmem:[#allocation10 + $0x10] sm:$0xff] }
 0x186   :  { %2821 = vmatpush.bf16.msra.mxu0 %v4697_v36 }
 0x187   :  { %v2092_v56 = vpop.f32.mrf.mxu2  ;;  %v2066_v38 = vpop.f32.mrf.mxu0 }
 0x188   :  { %2661 = vmatmul.bf16.vlgmr.msrb.gmra.mxu2 %v2177_v27  ;;  %v2106_v57 = vpop.f32.mrf.mxu3  ;;  %v2080_v58 = vpop.f32.mrf.mxu1  ;;  %v2067_v61 = vadd.f32 %v2066_v38, %v394_v54  ;;  %v2093_v10 = vadd.f32 %v2092_v56, %v2079_v39  ;;  %v2243_v54 = vld [vmem:[%s5126_s4] sm:$0x3] }
 0x189   :  { %2668 = vmatpush.bf16.msrb.mxu3 %v4259_v46  ;;  %v4705_v46 = vld [vmem:[#allocation10 + $0x68] sm:$0xff]  ;;  %v2245_v56 = vperm.slane %v2243_v54, 0 }
 0x18a   :  { %v2081_v44 = vadd.f32 %v2080_v58, %v2067_v61  ;;  %v2107_v6 = vadd.f32 %v2106_v57, %v2093_v10  ;;  %2822 = vmatpush.bf16.msra.mxu0 %v4696_v0  ;;  %2835 = vmatpush.bf16.msra.mxu1 %v4705_v46  ;;  %v4700_v57 = vld [vmem:[#allocation10 + $0x40] sm:$0xff]  ;;  %v4731_v0 = vld [vmem:[%s5128_s6] ss:$0 sm:$0xff] }
 0x18d   :  { %2669 = vmatpush.bf16.msrb.mxu3 %v4251_v52 }
 0x18e   :  { %2823 = vmatpush.bf16.msra.mxu0 %v4695_v40  ;;  %2836 = vmatpush.bf16.msra.mxu1 %v4704_v48 }
 0x18f   :  { %v2094_v17 = vpop.f32.mrf.mxu2 }
 0x190   :  { %v2108_v2 = vpop.f32.mrf.mxu3  ;;  %v2095_v47 = vadd.f32 %v2094_v17, %v2081_v44 }
 0x191   :  { %2670 = vmatpush.bf16.msrb.mxu3 %v4243_v55 }
 0x192   :  { %v2109_v11 = vadd.f32 %v2108_v2, %v2095_v47  ;;  %2824 = vmatpush.bf16.msra.mxu0 %v4694_v42  ;;  %2837 = vmatpush.bf16.msra.mxu1 %v4703_v51  ;;  %v2246_v2 = vperm.slane %v2243_v54, 1 }
 0x195   :  { %2671 = vmatpush.bf16.msrb.mxu3 %v4235_v59 }
 0x196   :  { %2825 = vmatpush.bf16.msra.mxu0 %v4693_v37  ;;  %2838 = vmatpush.bf16.msra.mxu1 %v4702_v9 }
 0x199   :  { %2672 = vmatpush.bf16.msrb.mxu3 %v4227_v30 }
 0x19a   :  { %2826 = vmatpush.bf16.msra.mxu0 %v4692_v50  ;;  %2839 = vmatpush.bf16.msra.mxu1 %v4701_v53 }
 0x19d   :  { %2673 = vmatpush.bf16.msrb.mxu3 %v4219_v43 }
 0x19e   :  { %2840 = vmatpush.bf16.msra.mxu1 %v4700_v57 }
 0x19f   :  { %v2120_v62 = vpop.f32.mrf.mxu0 }
 0x1a0   :  { %v2134_v41 = vpop.f32.mrf.mxu1  ;;  %v2121_v32 = vadd.f32 %v2120_v62, %v2107_v6 }
 0x1a1   :  { %2674 = vmatpush.bf16.msrb.mxu3 %v4211_v14 }
 0x1a2   :  { %v2135_v15 = vadd.f32 %v2134_v41, %v2121_v32 }
 0x1a7   :  { %v2148_v7 = vpop.f32.mrf.mxu2  ;;  %v2122_v13 = vpop.f32.mrf.mxu0 }
 0x1a8   :  { %v2162_v12 = vpop.f32.mrf.mxu3  ;;  %v2123_v16 = vadd.f32 %v2122_v13, %v2109_v11  ;;  %v2149_v19 = vadd.f32 %v2148_v7, %v2135_v15  ;;  %v2136_v21 = vpop.f32.mrf.mxu1 }
 0x1aa   :  { %v2137_v22 = vadd.f32 %v2136_v21, %v2123_v16  ;;  %v2163_v23 = vadd.f32 %v2162_v12, %v2149_v19 }
 0x1ac   :  { %v2170_v3 = vmax.f32 %v2163_v23, 0.0  ;;  %v4715_v23 = vld [vmem:[#allocation11 + $0x38] sm:$0xff] }
 0x1ad   :  { %2918 = vmatpush.bf16.msra.mxu2 %v4715_v23 }
 0x1af   :  { %v2150_v18 = vpop.f32.mrf.mxu2 }
 0x1b0   :  { %v2151_v25 = vadd.f32 %v2150_v18, %v2137_v22  ;;  %v2164_v26 = vpop.f32.mrf.mxu3 }
 0x1b2   :  { %v2165_v27 = vadd.f32 %v2164_v26, %v2151_v25  ;;  %v4714_v25 = vld [vmem:[#allocation11 + $0x30] sm:$0xff]  ;;  %v4713_v26 = vld [vmem:[#allocation11 + $0x28] sm:$0xff] }
 0x1b3   :  { %2919 = vmatpush.bf16.msra.mxu2 %v4714_v25 }
 0x1b4   :  { %v2174_v29 = vmax.f32 %v2165_v27, 0.0  ;;  %v4712_v27 = vld [vmem:[#allocation11 + $0x20] sm:$0xff] }
 0x1b6   :  { %v2178_v31 = vpack.c.bf16 %v2174_v29, %v2170_v3  ;;  %v4711_v3 = vld [vmem:[#allocation11 + $0x18] sm:$0xff]  ;;  %v4710_v29 = vld [vmem:[#allocation11 + $0x10] sm:$0xff] }
 0x1b7   :  { %2920 = vmatpush.bf16.msra.mxu2 %v4713_v26 }
 0x1b8   :  { %2619 = vmatmul.bf16.vlgmr.msra.gmra.mxu3 %v2178_v31 }
 0x1bb   :  { %2921 = vmatpush.bf16.msra.mxu2 %v4712_v27 }
 0x1bf   :  { %v2578_v52 = vpop.f32.mrf.mxu0  ;;  %2922 = vmatpush.bf16.msra.mxu2 %v4711_v3 }
 0x1c0   :  { %v2592_v55 = vpop.f32.mrf.mxu1  ;;  %v2579_v49 = vadd.f32 %v2578_v52, %v2245_v56  ;;  %v4732_v52 = vld [vmem:[%s5130_s8] ss:$0 sm:$0xff] }
 0x1c2   :  { %v2593_v60 = vadd.f32 %v2592_v55, %v2579_v49 }
 0x1c3   :  { %2923 = vmatpush.bf16.msra.mxu2 %v4710_v29 }
 0x1c7   :  { %v2580_v28 = vpop.f32.mrf.mxu0 }
 0x1c8   :  { %2675 = vmatmul.bf16.vlgmr.msrb.gmra.mxu3 %v2178_v31  ;;  %v2581_v59 = vadd.f32 %v2580_v28, %v2245_v56  ;;  %v2594_v24 = vpop.f32.mrf.mxu1  ;;  %v4709_v31 = vld [vmem:[#allocation11 + $0x8] sm:$0xff] }
 0x1c9   :  { %2924 = vmatpush.bf16.msra.mxu2 %v4709_v31 }
 0x1ca   :  { %v2595_v58 = vadd.f32 %v2594_v24, %v2581_v59 }
 0x1cd   :  { %2925 = vmatpush.bf16.msra.mxu2 %v4708_v34 }
 0x1df   :  { %v2634_v30 = vpop.f32.mrf.mxu0 }
 0x1e0   :  { %v2648_v10 = vpop.f32.mrf.mxu1  ;;  %v2635_v14 = vadd.f32 %v2634_v30, %v2246_v2 }
 0x1e2   :  { %v2649_v47 = vadd.f32 %v2648_v10, %v2635_v14 }
 0x1e7   :  { %v2636_v5 = vpop.f32.mrf.mxu0 }
 0x1e8   :  { %v2637_v6 = vadd.f32 %v2636_v5, %v2246_v2  ;;  %v2650_v32 = vpop.f32.mrf.mxu1 }
 0x1ea   :  { %v2651_v11 = vadd.f32 %v2650_v32, %v2637_v6 }
 0x1fb   :  { %v2606_v8 = vpop.f32.mrf.mxu2 }
 0x1fc   :  { %v2607_v39 = vadd.f32 %v2606_v8, %v2593_v60 }
 0x203   :  { %v2608_v1 = vpop.f32.mrf.mxu2 }
 0x204   :  { %v2609_v61 = vadd.f32 %v2608_v1, %v2595_v58 }
 0x20b   :  { %v2662_v44 = vpop.f32.mrf.mxu2 }
 0x20c   :  { %v2663_v12 = vadd.f32 %v2662_v44, %v2649_v47 }
 0x213   :  { %v2664_v7 = vpop.f32.mrf.mxu2 }
 0x214   :  { %v2665_v13 = vadd.f32 %v2664_v7, %v2651_v11 }
 0x23b   :  { %v2620_v38 = vpop.f32.mrf.mxu3 }
 0x23c   :  { %v2621_v17 = vadd.f32 %v2620_v38, %v2607_v39 }
 0x23e   :  { %v2681_v62 = vmax.f32 %v2621_v17, 0.0 }
 0x243   :  { %v2622_v63 = vpop.f32.mrf.mxu3 }
 0x244   :  { %v2623_v20 = vadd.f32 %v2622_v63, %v2609_v61 }
 0x246   :  { %v2683_v43 = vmax.f32 %v2623_v20, 0.0 }
 0x248   :  { %v2685_v4 = vpack.c.bf16 %v2683_v43, %v2681_v62 }
 0x24a   :  { %2827 = vmatmul.bf16.vlgmr.msra.gmra.mxu0 %v2685_v4 }
 0x24b   :  { %v2676_v41 = vpop.f32.mrf.mxu3 }
 0x24c   :  { %v2677_v15 = vadd.f32 %v2676_v41, %v2663_v12 }
 0x24e   :  { %v2682_v21 = vmax.f32 %v2677_v15, 0.0 }
 0x253   :  { %v2678_v16 = vpop.f32.mrf.mxu3 }
 0x254   :  { %v2679_v19 = vadd.f32 %v2678_v16, %v2665_v13 }
 0x256   :  { %v2684_v22 = vmax.f32 %v2679_v19, 0.0 }
 0x258   :  { %v2686_v18 = vpack.c.bf16 %v2684_v22, %v2682_v21 }
 0x25a   :  { %2841 = vmatmul.bf16.vlgmr.msra.gmra.mxu1 %v2686_v18 }
 0x2c7   :  { %v2828_v35 = vpop.f32.mrf.mxu0 }
 0x2c8   :  { %v2829_v33 = vadd.f32 %v4731_v0, %v2828_v35 }
 0x2cf   :  { %v2830_v40 = vpop.f32.mrf.mxu0 }
 0x2d0   :  { %v2831_v42 = vadd.f32 %v4731_v0, %v2830_v40 }
 0x2d7   :  { %v2842_v36 = vpop.f32.mrf.mxu1 }
 0x2d8   :  { %v2843_v45 = vadd.f32 %v2842_v36, %v2829_v33 }
 0x2da   :  { %v2847_v50 = vmax.f32 %v2843_v45, 0.0 }
 0x2df   :  { %v2844_v37 = vpop.f32.mrf.mxu1 }
 0x2e0   :  { %v2845_v46 = vadd.f32 %v2844_v37, %v2831_v42 }
 0x2e2   :  { %v2848_v48 = vmax.f32 %v2845_v46, 0.0 }
 0x2e4   :  { %v2849_v51 = vpack.c.bf16 %v2848_v48, %v2847_v50 }
 0x2e6   :  { %2926 = vmatmul.bf16.vlgmr.msra.gmra.mxu2 %v2849_v51 }
 0x369   :  { %v2927_v9 = vpop.f32.mrf.mxu2 }
 0x36a   :  { %v2928_v8 = vadd.f32 %v4732_v52, %v2927_v9 }
 0x36c   :  { %2932 = vst [vmem:[#allocation13] sm:$0xff] %v2928_v8 }
 0x371   :  { %v2929_v53 = vpop.f32.mrf.mxu2 }
 0x372   :  { %v2930_v54 = vadd.f32 %v4732_v52, %v2929_v53 }
 0x374   :  { %2933 = vst [vmem:[#allocation13 + $0x8] sm:$0xff] %v2930_v54 }
 0x375   :  { %2946 = dma.vmem_to_hbm [thread:$0]  %s2939_s26, 256, %s2941_s28, [#allocation4], %s4915_s21, %s4915_s21, %s4916_s22  }
 0x376   :  { %4909 = dma.done.wait [#allocation4], 256  }
 0x377   :  { %4910 = vsyncadd [#allocation4], 4294967040 }
 0x378   :  { %2951 = vsyncpa [#allocation3], 1 }
 0x379   :  { %2952 = vsyncpa [#allocation6], 1 }
 0x37a   :  { %2953 = vsyncpa [#allocation9], 1 }
 0x37b   :  { %2954 = vsyncpa [#allocation12], 1 }
 0x37c   :  { %2955 = vsyncpa [#allocation4], 1 }

</bundles_post_ra>
